<compile_context>
chip_gen: v5e
topology: v5e:2x2
jax: 0.10.0
libtpu: 0.0.40
codegen_flags: <defaults>
</compile_context>

<pallas_src>
import functools

import jax
import jax.numpy as jnp
from jax.experimental import pallas as pl
from jax.experimental.pallas import tpu as pltpu

INPUT_SIZE = 784
HIDDEN_SIZE = 600
NUM_CLASSES = 10

SUBLANE = 8
LANE = 128

IN_P = 896    # 784 padded to 7*128
HID_P = 640   # 600 padded to 5*128
OUT_P = 128   # 10  padded to 1*128


def _round_up(x, m):
    return (x + m - 1) // m * m


def mlp_kernel(x_ref, w1_ref, b1_ref, w2_ref, b2_ref, o_ref):
    # fc1: bf16 x bf16 -> f32 accumulation on the MXU; bias + ReLU fused on the VPU.
    h = jnp.dot(x_ref[...], w1_ref[...], preferred_element_type=jnp.float32)
    h = jnp.maximum(h + b1_ref[...], 0.0)
    # fc2: keep hidden in registers, cast to bf16 for the second MXU pass.
    out = jnp.dot(h.astype(w2_ref.dtype), w2_ref[...],
                  preferred_element_type=jnp.float32)
    o_ref[...] = (out + b2_ref[...]).astype(o_ref.dtype)


@functools.partial(jax.jit, static_argnames=("block_b",))
def net_forward(x, w1, b1, w2, b2, *, block_b=256):
    """x: (B, 784) f32; w1: (784, 600); b1: (600,); w2: (600, 10); b2: (10,)."""
    B = x.shape[0]
    # Batch tile: multiple of the 8-sublane grid; cap at block_b for large B.
    tb = min(block_b, _round_up(B, SUBLANE))
    b_pad = _round_up(B, tb)

    # Pad + cast. Zero padding contributes exactly nothing to the matmuls,
    # padded bias lanes are zero, padded rows/cols are sliced off afterwards.
    xp = jnp.zeros((b_pad, IN_P), jnp.bfloat16).at[:B, :INPUT_SIZE].set(
        x.astype(jnp.bfloat16))
    w1p = jnp.zeros((IN_P, HID_P), jnp.bfloat16).at[:INPUT_SIZE, :HIDDEN_SIZE].set(
        w1.astype(jnp.bfloat16))
    b1p = jnp.zeros((1, HID_P), jnp.float32).at[0, :HIDDEN_SIZE].set(b1)
    w2p = jnp.zeros((HID_P, OUT_P), jnp.bfloat16).at[:HIDDEN_SIZE, :NUM_CLASSES].set(
        w2.astype(jnp.bfloat16))
    b2p = jnp.zeros((1, OUT_P), jnp.float32).at[0, :NUM_CLASSES].set(b2)

    out = pl.pallas_call(
        mlp_kernel,
        out_shape=jax.ShapeDtypeStruct((b_pad, OUT_P), jnp.float32),
        grid=(b_pad // tb,),
        in_specs=[
            pl.BlockSpec((tb, IN_P), lambda i: (i, 0)),      # x: streamed per batch tile
            pl.BlockSpec((IN_P, HID_P), lambda i: (0, 0)),   # W1: VMEM-resident
            pl.BlockSpec((1, HID_P), lambda i: (0, 0)),      # b1: VMEM-resident
            pl.BlockSpec((HID_P, OUT_P), lambda i: (0, 0)),  # W2: VMEM-resident
            pl.BlockSpec((1, OUT_P), lambda i: (0, 0)),      # b2: VMEM-resident
        ],
        out_specs=pl.BlockSpec((tb, OUT_P), lambda i: (i, 0)),
        compiler_params=pltpu.CompilerParams(
            dimension_semantics=("parallel",),               # shard batch tiles across TCs
        ),
    )(xp, w1p, b1p, w2p, b2p)

    return out[:B, :NUM_CLASSES]


def init_params(key):
    """Deterministic init mimicking PyTorch nn.Linear defaults U[-1/sqrt(fan_in), +]."""
    k1, k2, k3, k4 = jax.random.split(key, 4)
    bound1 = 1.0 / (INPUT_SIZE ** 0.5)
    bound2 = 1.0 / (HIDDEN_SIZE ** 0.5)
    # Stored as [in, out] (already transposed relative to PyTorch's [out, in]).
    w1 = jax.random.uniform(k1, (INPUT_SIZE, HIDDEN_SIZE), jnp.float32, -bound1, bound1)
    b1 = jax.random.uniform(k2, (HIDDEN_SIZE,), jnp.float32, -bound1, bound1)
    w2 = jax.random.uniform(k3, (HIDDEN_SIZE, NUM_CLASSES), jnp.float32, -bound2, bound2)
    b2 = jax.random.uniform(k4, (NUM_CLASSES,), jnp.float32, -bound2, bound2)
    return w1, b1, w2, b2


def reference(x, w1, b1, w2, b2):
    # Same math, same bf16 weight precision, plain JAX (XLA dot).
    h = jnp.dot(x.astype(jnp.bfloat16), w1.astype(jnp.bfloat16),
                preferred_element_type=jnp.float32) + b1
    h = jnp.maximum(h, 0.0)
    return jnp.dot(h.astype(jnp.bfloat16), w2.astype(jnp.bfloat16),
                   preferred_element_type=jnp.float32) + b2


if __name__ == "__main__":
    key = jax.random.PRNGKey(0)
    kp, kx1, kx2 = jax.random.split(key, 3)
    w1, b1, w2, b2 = init_params(kp)

    # Small batch (single grid step, tb = 8).
    x_small = jax.random.normal(kx1, (8, INPUT_SIZE), jnp.float32)
    out_small = jax.block_until_ready(net_forward(x_small, w1, b1, w2, b2))
    ref_small = reference(x_small, w1, b1, w2, b2)
    assert out_small.shape == (8, NUM_CLASSES)
    assert jnp.allclose(out_small, ref_small, atol=2e-2, rtol=2e-2)

    # Larger, non-multiple batch (exercises padding + multi-step pipelined grid).
    x_big = jax.random.normal(kx2, (260, INPUT_SIZE), jnp.float32)
    out_big = jax.block_until_ready(net_forward(x_big, w1, b1, w2, b2))
    ref_big = reference(x_big, w1, b1, w2, b2)
    assert out_big.shape == (260, NUM_CLASSES)
    assert jnp.allclose(out_big, ref_big, atol=2e-2, rtol=2e-2)

    print("KERNEL_OK")
</pallas_src>

<mosaic_0001>
module attributes {stable_mosaic.version = 11 : i64} {
  func.func @mlp_kernel(%arg0: i32, %arg1: memref<8x896xbf16, #tpu.memory_space<vmem>>, %arg2: memref<896x640xbf16, #tpu.memory_space<vmem>>, %arg3: memref<1x640xf32, #tpu.memory_space<vmem>>, %arg4: memref<640x128xbf16, #tpu.memory_space<vmem>>, %arg5: memref<1x128xf32, #tpu.memory_space<vmem>>, %arg6: memref<8x128xf32, #tpu.memory_space<vmem>>) attributes {dimension_semantics = [#tpu.dimension_semantics<parallel>], iteration_bounds = array<i64: 1>, scalar_prefetch = 0 : i64, scratch_operands = 0 : i64, tpu.core_type = #tpu.core_type<tc>, window_params = [{transform_indices = @transform_0, window_bounds = array<i64: 8, 896>}, {pipeline_mode = #tpu.pipeline_mode<synchronous>, transform_indices = @transform_1, window_bounds = array<i64: 896, 640>}, {pipeline_mode = #tpu.pipeline_mode<synchronous>, transform_indices = @transform_2, window_bounds = array<i64: 1, 640>}, {pipeline_mode = #tpu.pipeline_mode<synchronous>, transform_indices = @transform_3, window_bounds = array<i64: 640, 128>}, {pipeline_mode = #tpu.pipeline_mode<synchronous>, transform_indices = @transform_4, window_bounds = array<i64: 1, 128>}, {transform_indices = @transform_5, window_bounds = array<i64: 8, 128>}]} {
    %c0 = arith.constant 0 : index
    %c0_0 = arith.constant 0 : index
    %0 = vector.load %arg1[%c0, %c0_0] : memref<8x896xbf16, #tpu.memory_space<vmem>>, vector<8x896xbf16>
    %c0_1 = arith.constant 0 : index
    %c0_2 = arith.constant 0 : index
    %1 = vector.load %arg2[%c0_1, %c0_2] : memref<896x640xbf16, #tpu.memory_space<vmem>>, vector<896x640xbf16>
    %cst = arith.constant dense<0.000000e+00> : vector<8x640xf32>
    %2 = tpu.matmul %0, %1, %cst {dimension_numbers = #tpu.dot_dimension_numbers<[1], [0], [0], [1], [0, 0, 1, 1], [], []>} : vector<8x896xbf16>, vector<896x640xbf16>, vector<8x640xf32> -> vector<8x640xf32>
    %c0_3 = arith.constant 0 : index
    %c0_4 = arith.constant 0 : index
    %3 = vector.load %arg3[%c0_3, %c0_4] : memref<1x640xf32, #tpu.memory_space<vmem>>, vector<1x640xf32>
    %4 = vector.broadcast %3 : vector<1x640xf32> to vector<8x640xf32>
    %5 = arith.addf %2, %4 : vector<8x640xf32>
    %cst_5 = arith.constant 0.000000e+00 : f32
    %6 = vector.broadcast %cst_5 : f32 to vector<8x640xf32>
    %7 = arith.maximumf %5, %6 : vector<8x640xf32>
    %8 = arith.truncf %7 : vector<8x640xf32> to vector<8x640xbf16>
    %c0_6 = arith.constant 0 : index
    %c0_7 = arith.constant 0 : index
    %9 = vector.load %arg4[%c0_6, %c0_7] : memref<640x128xbf16, #tpu.memory_space<vmem>>, vector<640x128xbf16>
    %cst_8 = arith.constant dense<0.000000e+00> : vector<8x128xf32>
    %10 = tpu.matmul %8, %9, %cst_8 {dimension_numbers = #tpu.dot_dimension_numbers<[1], [0], [0], [1], [0, 0, 1, 1], [], []>} : vector<8x640xbf16>, vector<640x128xbf16>, vector<8x128xf32> -> vector<8x128xf32>
    %c0_9 = arith.constant 0 : index
    %c0_10 = arith.constant 0 : index
    %11 = vector.load %arg5[%c0_9, %c0_10] : memref<1x128xf32, #tpu.memory_space<vmem>>, vector<1x128xf32>
    %12 = vector.broadcast %11 : vector<1x128xf32> to vector<8x128xf32>
    %13 = arith.addf %10, %12 : vector<8x128xf32>
    %c0_11 = arith.constant 0 : index
    %c0_12 = arith.constant 0 : index
    %14 = vector.load %arg6[%c0_11, %c0_12] : memref<8x128xf32, #tpu.memory_space<vmem>>, vector<8x128xf32>
    tpu.vector_store %arg6[%c0_11, %c0_12], %13 {strides = array<i32>} : memref<8x128xf32, #tpu.memory_space<vmem>>, vector<8x128xf32>,
    return
  }
  func.func @transform_0(%arg0: i32) -> (i32, i32) {
    %c0_i32 = arith.constant 0 : i32
    %c0_i32_0 = arith.constant 0 : i32
    return %arg0, %c0_i32 : i32, i32
  }
  func.func @transform_1(%arg0: i32) -> (i32, i32) {
    %c0_i32 = arith.constant 0 : i32
    %c0_i32_0 = arith.constant 0 : i32
    %c0_i32_1 = arith.constant 0 : i32
    return %c0_i32, %c0_i32_0 : i32, i32
  }
  func.func @transform_2(%arg0: i32) -> (i32, i32) {
    %c0_i32 = arith.constant 0 : i32
    %c0_i32_0 = arith.constant 0 : i32
    %c0_i32_1 = arith.constant 0 : i32
    return %c0_i32, %c0_i32_0 : i32, i32
  }
  func.func @transform_3(%arg0: i32) -> (i32, i32) {
    %c0_i32 = arith.constant 0 : i32
    %c0_i32_0 = arith.constant 0 : i32
    %c0_i32_1 = arith.constant 0 : i32
    return %c0_i32, %c0_i32_0 : i32, i32
  }
  func.func @transform_4(%arg0: i32) -> (i32, i32) {
    %c0_i32 = arith.constant 0 : i32
    %c0_i32_0 = arith.constant 0 : i32
    %c0_i32_1 = arith.constant 0 : i32
    return %c0_i32, %c0_i32_0 : i32, i32
  }
  func.func @transform_5(%arg0: i32) -> (i32, i32) {
    %c0_i32 = arith.constant 0 : i32
    %c0_i32_0 = arith.constant 0 : i32
    return %arg0, %c0_i32 : i32, i32
  }
}

</mosaic_0001>

<bundles_post_ra>
// kernel: net_forward.1
= control target key start
LH: loop header
LB: loop body
LE: loop exit
PB: predicated region body
PF: predicated region fallthrough
CT: control target
= control target key end

     0   :  { %s6287_s0 = inlined_call_operand.vmem [shape: bf16[8,896], index: 0, kind: input, shape index: {}]   ;;  %s6288_s1 = inlined_call_operand.vmem [shape: bf16[896,640], index: 1, kind: input, shape index: {}]   ;;  %s6289_s2 = inlined_call_operand.vmem [shape: f32[1,640], index: 2, kind: input, shape index: {}]   ;;  %s6290_s3 = inlined_call_operand.vmem [shape: bf16[640,128], index: 3, kind: input, shape index: {}]   ;;  %s6291_s4 = inlined_call_operand.vmem [shape: f32[1,128], index: 4, kind: input, shape index: {}]   ;;  %s6292_s5 = inlined_call_operand.hbm [shape: f32[8,128], index: 5, kind: output, shape index: {}]  }
   0x1   :  { %v2867_v0 = vld [vmem:[%s6288_s1 + $0x118] sm:$0xf]  ;;  %v4042_v1 = vld [vmem:[%s6288_s1 + $0x128] sm:$0xf0]  ;;  %v2847_v11 = vld [vmem:[%s6288_s1 + $0xf0] sm:$0xf] }
   0x2   :  { %v3027_v2 = vld [vmem:[%s6288_s1 + $0x258] sm:$0xf]  ;;  %v2868_v3 = vor.u32 %v4042_v1, %v2867_v0  ;;  %v4082_v4 = vld [vmem:[%s6288_s1 + $0x268] sm:$0xf0]  ;;  %v4037_v13 = vld [vmem:[%s6288_s1 + $0x100] sm:$0xf0] }
   0x3   :  { %v3187_v5 = vld [vmem:[%s6288_s1 + $0x398] sm:$0xf]  ;;  %v4122_v6 = vld [vmem:[%s6288_s1 + $0x3a8] sm:$0xf0]  ;;  %v3028_v7 = vor.u32 %v4082_v4, %v3027_v2  ;;  %v3007_v14 = vld [vmem:[%s6288_s1 + $0x230] sm:$0xf]  ;;  %v2848_v16 = vor.u32 %v4037_v13, %v2847_v11 }
   0x4   :  { %v3188_v8 = vor.u32 %v4122_v6, %v3187_v5  ;;  %v3347_v9 = vld [vmem:[%s6288_s1 + $0x4d8] sm:$0xf]  ;;  %v4162_v10 = vld [vmem:[%s6288_s1 + $0x4e8] sm:$0xf0]  ;;  %1854 = vmatpush.bf16.msra.mxu0 %v2868_v3  ;;  %v4077_v15 = vld [vmem:[%s6288_s1 + $0x240] sm:$0xf0] }
   0x5   :  { %v3348_v12 = vor.u32 %v4162_v10, %v3347_v9  ;;  %1867 = vmatpush.bf16.msra.mxu1 %v3028_v7  ;;  %v3008_v17 = vor.u32 %v4077_v15, %v3007_v14  ;;  %v3167_v18 = vld [vmem:[%s6288_s1 + $0x370] sm:$0xf]  ;;  %v4117_v19 = vld [vmem:[%s6288_s1 + $0x380] sm:$0xf0]  ;;  %v2827_v23 = vld [vmem:[%s6288_s1 + $0xc8] sm:$0xf] }
   0x6   :  { %1880 = vmatpush.bf16.msra.mxu2 %v3188_v8  ;;  %v3327_v20 = vld [vmem:[%s6288_s1 + $0x4b0] sm:$0xf]  ;;  %v3168_v21 = vor.u32 %v4117_v19, %v3167_v18  ;;  %v4157_v22 = vld [vmem:[%s6288_s1 + $0x4c0] sm:$0xf0]  ;;  %v4032_v24 = vld [vmem:[%s6288_s1 + $0xd8] sm:$0xf0] }
   0x7   :  { %1893 = vmatpush.bf16.msra.mxu3 %v3348_v12  ;;  %v3328_v25 = vor.u32 %v4157_v22, %v3327_v20  ;;  %v2987_v26 = vld [vmem:[%s6288_s1 + $0x208] sm:$0xf]  ;;  %v4072_v27 = vld [vmem:[%s6288_s1 + $0x218] sm:$0xf0]  ;;  %v2828_v29 = vor.u32 %v4032_v24, %v2827_v23  ;;  %v2807_v35 = vld [vmem:[%s6288_s1 + $0xa0] sm:$0xf] }
   0x8   :  { %v3147_v28 = vld [vmem:[%s6288_s1 + $0x348] sm:$0xf]  ;;  %1855 = vmatpush.bf16.msra.mxu0 %v2848_v16  ;;  %v4112_v30 = vld [vmem:[%s6288_s1 + $0x358] sm:$0xf0]  ;;  %v2988_v33 = vor.u32 %v4072_v27, %v2987_v26  ;;  %v4027_v36 = vld [vmem:[%s6288_s1 + $0xb0] sm:$0xf0] }
   0x9   :  { %v3307_v31 = vld [vmem:[%s6288_s1 + $0x488] sm:$0xf]  ;;  %v4152_v32 = vld [vmem:[%s6288_s1 + $0x498] sm:$0xf0]  ;;  %1868 = vmatpush.bf16.msra.mxu1 %v3008_v17  ;;  %v3148_v34 = vor.u32 %v4112_v30, %v3147_v28  ;;  %v2967_v37 = vld [vmem:[%s6288_s1 + $0x1e0] sm:$0xf]  ;;  %v2808_v44 = vor.u32 %v4027_v36, %v2807_v35 }
   0xa   :  { %1881 = vmatpush.bf16.msra.mxu2 %v3168_v21  ;;  %v3308_v38 = vor.u32 %v4152_v32, %v3307_v31  ;;  %v4067_v39 = vld [vmem:[%s6288_s1 + $0x1f0] sm:$0xf0]  ;;  %v3127_v40 = vld [vmem:[%s6288_s1 + $0x320] sm:$0xf]  ;;  %v2787_v47 = vld [vmem:[%s6288_s1 + $0x78] sm:$0xf] }
   0xb   :  { %1894 = vmatpush.bf16.msra.mxu3 %v3328_v25  ;;  %v4107_v41 = vld [vmem:[%s6288_s1 + $0x330] sm:$0xf0]  ;;  %v3287_v42 = vld [vmem:[%s6288_s1 + $0x460] sm:$0xf]  ;;  %v2968_v45 = vor.u32 %v4067_v39, %v2967_v37  ;;  %v4022_v48 = vld [vmem:[%s6288_s1 + $0x88] sm:$0xf0] }
   0xc   :  { %v4147_v43 = vld [vmem:[%s6288_s1 + $0x470] sm:$0xf0]  ;;  %1856 = vmatpush.bf16.msra.mxu0 %v2828_v29  ;;  %v3128_v46 = vor.u32 %v4107_v41, %v3127_v40  ;;  %v2947_v49 = vld [vmem:[%s6288_s1 + $0x1b8] sm:$0xf]  ;;  %v4062_v51 = vld [vmem:[%s6288_s1 + $0x1c8] sm:$0xf0]  ;;  %v2788_v56 = vor.u32 %v4022_v48, %v2787_v47 }
   0xd   :  { %1869 = vmatpush.bf16.msra.mxu1 %v2988_v33  ;;  %v3288_v50 = vor.u32 %v4147_v43, %v3287_v42  ;;  %v3107_v52 = vld [vmem:[%s6288_s1 + $0x2f8] sm:$0xf]  ;;  %v4102_v53 = vld [vmem:[%s6288_s1 + $0x308] sm:$0xf0]  ;;  %v2948_v57 = vor.u32 %v4062_v51, %v2947_v49  ;;  %v2767_v59 = vld [vmem:[%s6288_s1 + $0x50] sm:$0xf] }
   0xe   :  { %1882 = vmatpush.bf16.msra.mxu2 %v3148_v34  ;;  %v3267_v54 = vld [vmem:[%s6288_s1 + $0x438] sm:$0xf]  ;;  %v4142_v55 = vld [vmem:[%s6288_s1 + $0x448] sm:$0xf0]  ;;  %v3108_v58 = vor.u32 %v4102_v53, %v3107_v52  ;;  %v4017_v60 = vld [vmem:[%s6288_s1 + $0x60] sm:$0xf0] }
   0xf   :  { %1895 = vmatpush.bf16.msra.mxu3 %v3308_v38  ;;  %v2927_v61 = vld [vmem:[%s6288_s1 + $0x190] sm:$0xf]  ;;  %v3268_v62 = vor.u32 %v4142_v55, %v3267_v54  ;;  %v4057_v63 = vld [vmem:[%s6288_s1 + $0x1a0] sm:$0xf0]  ;;  %v2768_v4 = vor.u32 %v4017_v60, %v2767_v59  ;;  %v2747_v7 = vld [vmem:[%s6288_s1 + $0x28] sm:$0xf] }
  0x10   :  { %1857 = vmatpush.bf16.msra.mxu0 %v2808_v44  ;;  %v3087_v0 = vld [vmem:[%s6288_s1 + $0x2d0] sm:$0xf]  ;;  %v4097_v1 = vld [vmem:[%s6288_s1 + $0x2e0] sm:$0xf0]  ;;  %v2928_v5 = vor.u32 %v4057_v63, %v2927_v61  ;;  %v4012_v8 = vld [vmem:[%s6288_s1 + $0x38] sm:$0xf0] }
  0x11   :  { %1870 = vmatpush.bf16.msra.mxu1 %v2968_v45  ;;  %v3247_v2 = vld [vmem:[%s6288_s1 + $0x410] sm:$0xf]  ;;  %v4137_v3 = vld [vmem:[%s6288_s1 + $0x420] sm:$0xf0]  ;;  %v3088_v6 = vor.u32 %v4097_v1, %v3087_v0  ;;  %v2907_v9 = vld [vmem:[%s6288_s1 + $0x168] sm:$0xf]  ;;  %v2748_v16 = vor.u32 %v4012_v8, %v2747_v7 }
  0x12   :  { %1883 = vmatpush.bf16.msra.mxu2 %v3128_v46  ;;  %v3248_v10 = vor.u32 %v4137_v3, %v3247_v2  ;;  %v4052_v11 = vld [vmem:[%s6288_s1 + $0x178] sm:$0xf0]  ;;  %v3067_v12 = vld [vmem:[%s6288_s1 + $0x2a8] sm:$0xf]  ;;  %v2727_v17 = vld [vmem:[%s6288_s1] sm:$0xf] }
  0x13   :  { %1896 = vmatpush.bf16.msra.mxu3 %v3288_v50  ;;  %v4092_v13 = vld [vmem:[%s6288_s1 + $0x2b8] sm:$0xf0]  ;;  %v3227_v14 = vld [vmem:[%s6288_s1 + $0x3e8] sm:$0xf]  ;;  %v4007_v18 = vld [vmem:[%s6288_s1 + $0x10] sm:$0xf0]  ;;  %v2908_v19 = vor.u32 %v4052_v11, %v2907_v9 }
  0x14   :  { %1858 = vmatpush.bf16.msra.mxu0 %v2788_v56  ;;  %v4132_v15 = vld [vmem:[%s6288_s1 + $0x3f8] sm:$0xf0]  ;;  %v3068_v20 = vor.u32 %v4092_v13, %v3067_v12  ;;  %v2887_v21 = vld [vmem:[%s6288_s1 + $0x140] sm:$0xf]  ;;  %v4047_v22 = vld [vmem:[%s6288_s1 + $0x150] sm:$0xf0]  ;;  %v2728_v31 = vor.u32 %v4007_v18, %v2727_v17 }
  0x15   :  { %1871 = vmatpush.bf16.msra.mxu1 %v2948_v57  ;;  %v3047_v23 = vld [vmem:[%s6288_s1 + $0x280] sm:$0xf]  ;;  %v3228_v24 = vor.u32 %v4132_v15, %v3227_v14  ;;  %v4087_v25 = vld [vmem:[%s6288_s1 + $0x290] sm:$0xf0]  ;;  %v3507_v28 = vld [vmem:[%s6288_s1 + $0x618] sm:$0xf]  ;;  %v2888_v35 = vor.u32 %v4047_v22, %v2887_v21 }
  0x16   :  { %1884 = vmatpush.bf16.msra.mxu2 %v3108_v58  ;;  %v3207_v26 = vld [vmem:[%s6288_s1 + $0x3c0] sm:$0xf]  ;;  %v4127_v27 = vld [vmem:[%s6288_s1 + $0x3d0] sm:$0xf0]  ;;  %v4202_v29 = vld [vmem:[%s6288_s1 + $0x628] sm:$0xf0]  ;;  %v3048_v36 = vor.u32 %v4087_v25, %v3047_v23 }
  0x17   :  { %1897 = vmatpush.bf16.msra.mxu3 %v3268_v62  ;;  %v3667_v30 = vld [vmem:[%s6288_s1 + $0x758] sm:$0xf]  ;;  %v4242_v32 = vld [vmem:[%s6288_s1 + $0x768] sm:$0xf0]  ;;  %v4040_v37 = vld [vmem:[%s6288_s1 + $0x11c] sm:$0xf]  ;;  %v3208_v39 = vor.u32 %v4127_v27, %v3207_v26  ;;  %v3508_v40 = vor.u32 %v4202_v29, %v3507_v28 }
  0x18   :  { %1859 = vmatpush.bf16.msra.mxu0 %v2768_v4  ;;  %v3827_v33 = vld [vmem:[%s6288_s1 + $0x898] sm:$0xf]  ;;  %v4282_v34 = vld [vmem:[%s6288_s1 + $0x8a8] sm:$0xf0]  ;;  %v2869_v38 = vld [vmem:[%s6288_s1 + $0x12c] sm:$0xf0]  ;;  %v3668_v41 = vor.u32 %v4242_v32, %v3667_v30 }
  0x19   :  { %1872 = vmatpush.bf16.msra.mxu1 %v2928_v5  ;;  %v3828_v42 = vor.u32 %v4282_v34, %v3827_v33  ;;  %v3487_v43 = vld [vmem:[%s6288_s1 + $0x5f0] sm:$0xf]  ;;  %v4197_v44 = vld [vmem:[%s6288_s1 + $0x600] sm:$0xf0]  ;;  %v2872_v46 = vor.u32 %v4040_v37, %v2869_v38  ;;  %v4035_v50 = vld [vmem:[%s6288_s1 + $0xf4] sm:$0xf] }
  0x1a   :  { %1885 = vmatpush.bf16.msra.mxu2 %v3088_v6  ;;  %v3647_v45 = vld [vmem:[%s6288_s1 + $0x730] sm:$0xf]  ;;  %v4237_v47 = vld [vmem:[%s6288_s1 + $0x740] sm:$0xf0]  ;;  %v2849_v51 = vld [vmem:[%s6288_s1 + $0x104] sm:$0xf0]  ;;  %v3488_v52 = vor.u32 %v4197_v44, %v3487_v43 }
  0x1b   :  { %1898 = vmatpush.bf16.msra.mxu3 %v3248_v10  ;;  %v3807_v48 = vld [vmem:[%s6288_s1 + $0x870] sm:$0xf]  ;;  %v4277_v49 = vld [vmem:[%s6288_s1 + $0x880] sm:$0xf0]  ;;  %v3467_v53 = vld [vmem:[%s6288_s1 + $0x5c8] sm:$0xf]  ;;  %v3648_v54 = vor.u32 %v4237_v47, %v3647_v45  ;;  %v2852_v59 = vor.u32 %v4035_v50, %v2849_v51 }
  0x1c   :  { %1860 = vmatpush.bf16.msra.mxu0 %v2748_v16  ;;  %v3808_v55 = vor.u32 %v4277_v49, %v3807_v48  ;;  %v4192_v56 = vld [vmem:[%s6288_s1 + $0x5d8] sm:$0xf0]  ;;  %v3627_v57 = vld [vmem:[%s6288_s1 + $0x708] sm:$0xf]  ;;  %v4030_v62 = vld [vmem:[%s6288_s1 + $0xcc] sm:$0xf] }
  0x1d   :  { %1873 = vmatpush.bf16.msra.mxu1 %v2908_v19  ;;  %v4232_v58 = vld [vmem:[%s6288_s1 + $0x718] sm:$0xf0]  ;;  %v3787_v60 = vld [vmem:[%s6288_s1 + $0x848] sm:$0xf]  ;;  %v2829_v63 = vld [vmem:[%s6288_s1 + $0xdc] sm:$0xf0]  ;;  %v3468_v0 = vor.u32 %v4192_v56, %v3467_v53 }
  0x1e   :  { %1886 = vmatpush.bf16.msra.mxu2 %v3068_v20  ;;  %v4272_v61 = vld [vmem:[%s6288_s1 + $0x858] sm:$0xf0]  ;;  %v3628_v1 = vor.u32 %v4232_v58, %v3627_v57  ;;  %v22_v2 = vld [vmem:[%s6287_s0 + $0x8] sm:$0xff]  ;;  %v21_v3 = vld [vmem:[%s6287_s0] sm:$0xff]  ;;  %v2832_v11 = vor.u32 %v4030_v62, %v2829_v63 }
  0x1f   :  { %1899 = vmatpush.bf16.msra.mxu3 %v3228_v24  ;;  %v3788_v4 = vor.u32 %v4272_v61, %v3787_v60  ;;  %v3447_v5 = vld [vmem:[%s6288_s1 + $0x5a0] sm:$0xf]  ;;  %v4187_v6 = vld [vmem:[%s6288_s1 + $0x5b0] sm:$0xf0]  ;;  %v379_v8 = vunpack.c.l.b16 %v22_v2  ;;  %v377_v9 = vunpack.c.l.b16 %v21_v3  ;;  %v378_v10 = vunpack.c.h.b16 %v21_v3  ;;  %v4025_v16 = vld [vmem:[%s6288_s1 + $0xa4] sm:$0xf] }
  0x20   :  { %1861 = vmatpush.bf16.msra.mxu0 %v2728_v31  ;;  %v3607_v7 = vld [vmem:[%s6288_s1 + $0x6e0] sm:$0xf]  ;;  %v4227_v12 = vld [vmem:[%s6288_s1 + $0x6f0] sm:$0xf0]  ;;  %v380_v15 = vunpack.c.h.b16 %v22_v2  ;;  %v2809_v17 = vld [vmem:[%s6288_s1 + $0xb4] sm:$0xf0]  ;;  %v3448_v20 = vor.u32 %v4187_v6, %v3447_v5 }
  0x21   :  { %1874 = vmatpush.bf16.msra.mxu1 %v2888_v35  ;;  %v3767_v13 = vld [vmem:[%s6288_s1 + $0x820] sm:$0xf]  ;;  %v4267_v14 = vld [vmem:[%s6288_s1 + $0x830] sm:$0xf0]  ;;  %v4679_v18 = vpack.c.b16 %v379_v8, %v379_v8  ;;  %v4681_v19 = vpack.c.b16 %v377_v9, %v377_v9  ;;  %v4683_v21 = vpack.c.b16 %v378_v10, %v378_v10  ;;  %v3608_v23 = vor.u32 %v4227_v12, %v3607_v7  ;;  %v3427_v25 = vld [vmem:[%s6288_s1 + $0x578] sm:$0xf] }
  0x22   :  { %1887 = vmatpush.bf16.msra.mxu2 %v3048_v36  ;;  %v4685_v22 = vpack.c.b16 %v380_v15, %v380_v15  ;;  %v3768_v24 = vor.u32 %v4267_v14, %v3767_v13  ;;  %v4182_v26 = vld [vmem:[%s6288_s1 + $0x588] sm:$0xf0]  ;;  %v3587_v27 = vld [vmem:[%s6288_s1 + $0x6b8] sm:$0xf]  ;;  %v2812_v28 = vor.u32 %v4025_v16, %v2809_v17  ;;  %v4020_v32 = vld [vmem:[%s6288_s1 + $0x7c] sm:$0xf] }
  0x23   :  { %1900 = vmatpush.bf16.msra.mxu3 %v3208_v39  ;;  %v4222_v29 = vld [vmem:[%s6288_s1 + $0x6c8] sm:$0xf0]  ;;  %v3747_v30 = vld [vmem:[%s6288_s1 + $0x7f8] sm:$0xf]  ;;  %v2789_v33 = vld [vmem:[%s6288_s1 + $0x8c] sm:$0xf0]  ;;  %1862 = vmatmul.bf16.vlgmr.msra.gmra.mxu0 %v4681_v19  ;;  %v3428_v34 = vor.u32 %v4182_v26, %v3427_v25 }
  0x24   :  { %1906 = vmatpush.bf16.msrb.mxu0 %v3508_v40  ;;  %v4262_v31 = vld [vmem:[%s6288_s1 + $0x808] sm:$0xf0]  ;;  %1875 = vmatmul.bf16.vlgmr.msra.gmra.mxu1 %v4683_v21  ;;  %v3588_v35 = vor.u32 %v4222_v29, %v3587_v27  ;;  %v3407_v37 = vld [vmem:[%s6288_s1 + $0x550] sm:$0xf]  ;;  %v4177_v38 = vld [vmem:[%s6288_s1 + $0x560] sm:$0xf0]  ;;  %v2792_v40 = vor.u32 %v4020_v32, %v2789_v33 }
  0x25   :  { %1919 = vmatpush.bf16.msrb.mxu1 %v3668_v41  ;;  %1888 = vmatmul.bf16.vlgmr.msra.gmra.mxu2 %v4679_v18  ;;  %v3748_v36 = vor.u32 %v4262_v31, %v3747_v30  ;;  %v3567_v39 = vld [vmem:[%s6288_s1 + $0x690] sm:$0xf]  ;;  %v4217_v41 = vld [vmem:[%s6288_s1 + $0x6a0] sm:$0xf0]  ;;  %v4015_v44 = vld [vmem:[%s6288_s1 + $0x54] sm:$0xf] }
  0x26   :  { %1932 = vmatpush.bf16.msrb.mxu2 %v3828_v42  ;;  %1901 = vmatmul.bf16.vlgmr.msra.gmra.mxu3 %v4685_v22  ;;  %v3727_v42 = vld [vmem:[%s6288_s1 + $0x7d0] sm:$0xf]  ;;  %v4257_v43 = vld [vmem:[%s6288_s1 + $0x7e0] sm:$0xf0]  ;;  %v2769_v45 = vld [vmem:[%s6288_s1 + $0x64] sm:$0xf0]  ;;  %v3568_v47 = vor.u32 %v4217_v41, %v3567_v39 }
  0x27   :  { %1945 = vmatpush.bf16.msrb.mxu3 %v2872_v46  ;;  %v3408_v46 = vor.u32 %v4177_v38, %v3407_v37  ;;  %v3728_v48 = vor.u32 %v4257_v43, %v3727_v42  ;;  %v3387_v49 = vld [vmem:[%s6288_s1 + $0x528] sm:$0xf]  ;;  %v4172_v50 = vld [vmem:[%s6288_s1 + $0x538] sm:$0xf0]  ;;  %v4010_v56 = vld [vmem:[%s6288_s1 + $0x2c] sm:$0xf] }
  0x28   :  { %1907 = vmatpush.bf16.msrb.mxu0 %v3488_v52  ;;  %v3547_v51 = vld [vmem:[%s6288_s1 + $0x668] sm:$0xf]  ;;  %v2772_v52 = vor.u32 %v4015_v44, %v2769_v45  ;;  %v4212_v53 = vld [vmem:[%s6288_s1 + $0x678] sm:$0xf0]  ;;  %v2749_v57 = vld [vmem:[%s6288_s1 + $0x3c] sm:$0xf0] }
  0x29   :  { %1920 = vmatpush.bf16.msrb.mxu1 %v3648_v54  ;;  %v3707_v54 = vld [vmem:[%s6288_s1 + $0x7a8] sm:$0xf]  ;;  %v3367_v58 = vld [vmem:[%s6288_s1 + $0x500] sm:$0xf]  ;;  %v4167_v60 = vld [vmem:[%s6288_s1 + $0x510] sm:$0xf0]  ;;  %v3548_v63 = vor.u32 %v4212_v53, %v3547_v51 }
  0x2a   :  { %1933 = vmatpush.bf16.msrb.mxu2 %v3808_v55  ;;  %v4252_v55 = vld [vmem:[%s6288_s1 + $0x7b8] sm:$0xf0]  ;;  %v3527_v61 = vld [vmem:[%s6288_s1 + $0x640] sm:$0xf]  ;;  %v4207_v62 = vld [vmem:[%s6288_s1 + $0x650] sm:$0xf0] }
  0x2b   :  { %1946 = vmatpush.bf16.msrb.mxu3 %v2852_v59  ;;  %v3388_v59 = vor.u32 %v4172_v50, %v3387_v49  ;;  %v4247_v2 = vld [vmem:[%s6288_s1 + $0x790] sm:$0xf0]  ;;  %v24_v3 = vld [vmem:[%s6287_s0 + $0x18] sm:$0xf]  ;;  %v4005_v5 = vld [vmem:[%s6288_s1 + $0x4] sm:$0xf]  ;;  %v3528_v16 = vor.u32 %v4207_v62, %v3527_v61 }
  0x2c   :  { %1908 = vmatpush.bf16.msrb.mxu0 %v3468_v0  ;;  %v3708_v0 = vor.u32 %v4252_v55, %v3707_v54  ;;  %v2729_v6 = vld [vmem:[%s6288_s1 + $0x14] sm:$0xf0]  ;;  %v23_v7 = vld [vmem:[%s6287_s0 + $0x10] sm:$0xff]  ;;  %v4080_v8 = vld [vmem:[%s6288_s1 + $0x25c] sm:$0xf]  ;;  %v383_v15 = vunpack.c.l.b16 %v24_v3 }
  0x2d   :  { %1921 = vmatpush.bf16.msrb.mxu1 %v3628_v1  ;;  %v3687_v1 = vld [vmem:[%s6288_s1 + $0x780] sm:$0xf]  ;;  %v3029_v9 = vld [vmem:[%s6288_s1 + $0x26c] sm:$0xf0]  ;;  %v4120_v10 = vld [vmem:[%s6288_s1 + $0x39c] sm:$0xf]  ;;  %v382_v25 = vunpack.c.h.b16 %v23_v7  ;;  %v2732_v26 = vor.u32 %v4005_v5, %v2729_v6 }
  0x2e   :  { %1934 = vmatpush.bf16.msrb.mxu2 %v3788_v4  ;;  %v2752_v4 = vor.u32 %v4010_v56, %v2749_v57  ;;  %v3189_v12 = vld [vmem:[%s6288_s1 + $0x3ac] sm:$0xf0]  ;;  %v4160_v13 = vld [vmem:[%s6288_s1 + $0x4dc] sm:$0xf]  ;;  %v3688_v17 = vor.u32 %v4247_v2, %v3687_v1  ;;  %v3032_v27 = vor.u32 %v4080_v8, %v3029_v9  ;;  %v4075_v30 = vld [vmem:[%s6288_s1 + $0x234] sm:$0xf]  ;;  %v4835_v37 = vpack.c.b16 %v383_v15, %v383_v15 }
  0x2f   :  { %1947 = vmatpush.bf16.msrb.mxu3 %v2832_v11  ;;  %v3368_v11 = vor.u32 %v4167_v60, %v3367_v58  ;;  %v3349_v14 = vld [vmem:[%s6288_s1 + $0x4ec] sm:$0xf0]  ;;  %v3009_v31 = vld [vmem:[%s6288_s1 + $0x244] sm:$0xf0]  ;;  %v4115_v32 = vld [vmem:[%s6288_s1 + $0x374] sm:$0xf]  ;;  %v4845_v41 = vpack.c.b16 %v382_v25, %v382_v25 }
  0x30   :  { %1909 = vmatpush.bf16.msrb.mxu0 %v3448_v20  ;;  %v4200_v20 = vld [vmem:[%s6288_s1 + $0x61c] sm:$0xf]  ;;  %v3352_v29 = vor.u32 %v4160_v13, %v3349_v14  ;;  %v4195_v38 = vld [vmem:[%s6288_s1 + $0x5f4] sm:$0xf]  ;;  %v3489_v39 = vld [vmem:[%s6288_s1 + $0x604] sm:$0xf0]  ;;  %v3012_v42 = vor.u32 %v4075_v30, %v3009_v31 }
  0x31   :  { %1922 = vmatpush.bf16.msrb.mxu1 %v3608_v23  ;;  %v3509_v23 = vld [vmem:[%s6288_s1 + $0x62c] sm:$0xf0]  ;;  %v4070_v45 = vld [vmem:[%s6288_s1 + $0x20c] sm:$0xf]  ;;  %v3149_v49 = vld [vmem:[%s6288_s1 + $0x35c] sm:$0xf0] }
  0x32   :  { %1935 = vmatpush.bf16.msrb.mxu2 %v3768_v24  ;;  %v381_v24 = vunpack.c.l.b16 %v23_v7  ;;  %v3512_v33 = vor.u32 %v4200_v20, %v3509_v23  ;;  %v4150_v50 = vld [vmem:[%s6288_s1 + $0x48c] sm:$0xf]  ;;  %v3309_v51 = vld [vmem:[%s6288_s1 + $0x49c] sm:$0xf0]  ;;  %v4065_v57 = vld [vmem:[%s6288_s1 + $0x1e4] sm:$0xf] }
  0x33   :  { %1948 = vmatpush.bf16.msrb.mxu3 %v2812_v28  ;;  %v3192_v28 = vor.u32 %v4120_v10, %v3189_v12  ;;  %v3469_v53 = vld [vmem:[%s6288_s1 + $0x5dc] sm:$0xf0]  ;;  %v3312_v56 = vor.u32 %v4150_v50, %v3309_v51  ;;  %v2969_v58 = vld [vmem:[%s6288_s1 + $0x1f4] sm:$0xf0]  ;;  %v4145_v62 = vld [vmem:[%s6288_s1 + $0x464] sm:$0xf] }
  0x34   :  { %1910 = vmatpush.bf16.msrb.mxu0 %v3428_v34  ;;  %v3169_v34 = vld [vmem:[%s6288_s1 + $0x384] sm:$0xf0]  ;;  %v3129_v61 = vld [vmem:[%s6288_s1 + $0x334] sm:$0xf0]  ;;  %v2972_v2 = vor.u32 %v4065_v57, %v2969_v58  ;;  %v4060_v5 = vld [vmem:[%s6288_s1 + $0x1bc] sm:$0xf] }
  0x35   :  { %1923 = vmatpush.bf16.msrb.mxu1 %v3588_v35  ;;  %v4155_v35 = vld [vmem:[%s6288_s1 + $0x4b4] sm:$0xf]  ;;  %v3172_v43 = vor.u32 %v4115_v32, %v3169_v34  ;;  %v3449_v1 = vld [vmem:[%s6288_s1 + $0x5b4] sm:$0xf0]  ;;  %v2949_v6 = vld [vmem:[%s6288_s1 + $0x1cc] sm:$0xf0] }
  0x36   :  { %1936 = vmatpush.bf16.msrb.mxu2 %v3748_v36  ;;  %v3329_v36 = vld [vmem:[%s6288_s1 + $0x4c4] sm:$0xf0]  ;;  %v4100_v7 = vld [vmem:[%s6288_s1 + $0x2fc] sm:$0xf]  ;;  %v3109_v9 = vld [vmem:[%s6288_s1 + $0x30c] sm:$0xf0]  ;;  %v2952_v14 = vor.u32 %v4060_v5, %v2949_v6 }
  0x37   :  { %1949 = vmatpush.bf16.msrb.mxu3 %v2792_v40  ;;  %v4843_v40 = vpack.c.b16 %v381_v24, %v381_v24  ;;  %v3332_v44 = vor.u32 %v4155_v35, %v3329_v36  ;;  %v4140_v10 = vld [vmem:[%s6288_s1 + $0x43c] sm:$0xf]  ;;  %v3429_v13 = vld [vmem:[%s6288_s1 + $0x58c] sm:$0xf0]  ;;  %v3112_v15 = vor.u32 %v4100_v7, %v3109_v9  ;;  %v2929_v20 = vld [vmem:[%s6288_s1 + $0x1a4] sm:$0xf0] }
  0x38   :  { %1911 = vmatpush.bf16.msrb.mxu0 %v3408_v46  ;;  %v2989_v46 = vld [vmem:[%s6288_s1 + $0x21c] sm:$0xf0]  ;;  %v4180_v12 = vld [vmem:[%s6288_s1 + $0x57c] sm:$0xf]  ;;  %v4095_v23 = vld [vmem:[%s6288_s1 + $0x2d4] sm:$0xf] }
  0x39   :  { %1924 = vmatpush.bf16.msrb.mxu1 %v3568_v47  ;;  %v4110_v47 = vld [vmem:[%s6288_s1 + $0x34c] sm:$0xf]  ;;  %v2992_v54 = vor.u32 %v4070_v45, %v2989_v46  ;;  %v3432_v24 = vor.u32 %v4180_v12, %v3429_v13  ;;  %v3089_v25 = vld [vmem:[%s6288_s1 + $0x2e4] sm:$0xf0] }
  0x3a   :  { %1937 = vmatpush.bf16.msrb.mxu2 %v3728_v48  ;;  %v3492_v48 = vor.u32 %v4195_v38, %v3489_v39  ;;  %v3152_v55 = vor.u32 %v4110_v47, %v3149_v49 }
  0x3b   :  { %1950 = vmatpush.bf16.msrb.mxu3 %v2772_v52  ;;  %v4190_v52 = vld [vmem:[%s6288_s1 + $0x5cc] sm:$0xf] }
  0x3c   :  { %1912 = vmatpush.bf16.msrb.mxu0 %v3388_v59  ;;  %v4105_v59 = vld [vmem:[%s6288_s1 + $0x324] sm:$0xf]  ;;  %v3472_v60 = vor.u32 %v4190_v52, %v3469_v53 }
  0x3d   :  { %1925 = vmatpush.bf16.msrb.mxu1 %v3548_v63  ;;  %v3289_v63 = vld [vmem:[%s6288_s1 + $0x474] sm:$0xf0]  ;;  %v3132_v3 = vor.u32 %v4105_v59, %v3129_v61 }
  0x3e   :  { %1938 = vmatpush.bf16.msrb.mxu2 %v3708_v0  ;;  %v4185_v0 = vld [vmem:[%s6288_s1 + $0x5a4] sm:$0xf] }
  0x3f   :  { %1951 = vmatpush.bf16.msrb.mxu3 %v2752_v4  ;;  %v3292_v4 = vor.u32 %v4145_v62, %v3289_v63  ;;  %v3452_v8 = vor.u32 %v4185_v0, %v3449_v1 }
  0x40   :  { %1913 = vmatpush.bf16.msrb.mxu0 %v3368_v11  ;;  %v3269_v11 = vld [vmem:[%s6288_s1 + $0x44c] sm:$0xf0] }
  0x41   :  { %1926 = vmatpush.bf16.msrb.mxu1 %v3528_v16  ;;  %v3272_v16 = vor.u32 %v4140_v10, %v3269_v11 }
  0x42   :  { %1939 = vmatpush.bf16.msrb.mxu2 %v3688_v17  ;;  %v4055_v17 = vld [vmem:[%s6288_s1 + $0x194] sm:$0xf] }
  0x43   :  { %1952 = vmatpush.bf16.msrb.mxu3 %v2732_v26  ;;  %1914 = vmatmul.bf16.vlgmr.msrb.gmra.mxu0 %v4843_v40  ;;  %v4135_v26 = vld [vmem:[%s6288_s1 + $0x414] sm:$0xf]  ;;  %v2932_v30 = vor.u32 %v4055_v17, %v2929_v20 }
  0x44   :  { %1958 = vmatpush.bf16.msra.mxu0 %v3032_v27  ;;  %1927 = vmatmul.bf16.vlgmr.msrb.gmra.mxu1 %v4845_v41  ;;  %v3249_v27 = vld [vmem:[%s6288_s1 + $0x424] sm:$0xf0] }
  0x45   :  { %1971 = vmatpush.bf16.msra.mxu1 %v3192_v28  ;;  %1940 = vmatmul.bf16.vlgmr.msrb.gmra.mxu2 %v4835_v37  ;;  %v4175_v28 = vld [vmem:[%s6288_s1 + $0x554] sm:$0xf] }
  0x46   :  { %1984 = vmatpush.bf16.msra.mxu2 %v3352_v29  ;;  %1953 = vmatmul.bf16.vlgmr.msrb.gmra.mxu3 %v4681_v19  ;;  %v3409_v29 = vld [vmem:[%s6288_s1 + $0x564] sm:$0xf0] }
  0x47   :  { %1997 = vmatpush.bf16.msra.mxu3 %v3512_v33 }
  0x48   :  { %1959 = vmatpush.bf16.msra.mxu0 %v3012_v42 }
  0x49   :  { %1972 = vmatpush.bf16.msra.mxu1 %v3172_v43 }
  0x4a   :  { %1985 = vmatpush.bf16.msra.mxu2 %v3332_v44 }
  0x4b   :  { %1998 = vmatpush.bf16.msra.mxu3 %v3492_v48 }
  0x4c   :  { %1960 = vmatpush.bf16.msra.mxu0 %v2992_v54 }
  0x4d   :  { %1973 = vmatpush.bf16.msra.mxu1 %v3152_v55 }
  0x4e   :  { %1986 = vmatpush.bf16.msra.mxu2 %v3312_v56 }
  0x4f   :  { %1999 = vmatpush.bf16.msra.mxu3 %v3472_v60 }
  0x50   :  { %1961 = vmatpush.bf16.msra.mxu0 %v2972_v2 }
  0x51   :  { %1974 = vmatpush.bf16.msra.mxu1 %v3132_v3 }
  0x52   :  { %1987 = vmatpush.bf16.msra.mxu2 %v3292_v4 }
  0x53   :  { %2000 = vmatpush.bf16.msra.mxu3 %v3452_v8 }
  0x54   :  { %1962 = vmatpush.bf16.msra.mxu0 %v2952_v14 }
  0x55   :  { %10 = vsyncpa [#allocation3], 0  ;;  %1975 = vmatpush.bf16.msra.mxu1 %v3112_v15  ;;  %v3092_v31 = vor.u32 %v4095_v23, %v3089_v25  ;;  %v3252_v32 = vor.u32 %v4135_v26, %v3249_v27  ;;  %v4050_v33 = vld [vmem:[%s6288_s1 + $0x16c] sm:$0xf]  ;;  %v2909_v34 = vld [vmem:[%s6288_s1 + $0x17c] sm:$0xf0]  ;;  %v3412_v36 = vor.u32 %v4175_v28, %v3409_v29 }
  0x56   :  { %1988 = vmatpush.bf16.msra.mxu2 %v3272_v16  ;;  %v4090_v35 = vld [vmem:[%s6288_s1 + $0x2ac] sm:$0xf]  ;;  %v3069_v38 = vld [vmem:[%s6288_s1 + $0x2bc] sm:$0xf0]  ;;  %v2912_v45 = vor.u32 %v4050_v33, %v2909_v34  ;;  %v4045_v46 = vld [vmem:[%s6288_s1 + $0x144] sm:$0xf] }
  0x57   :  { %2001 = vmatpush.bf16.msra.mxu3 %v3432_v24  ;;  %v4130_v39 = vld [vmem:[%s6288_s1 + $0x3ec] sm:$0xf]  ;;  %v3229_v42 = vld [vmem:[%s6288_s1 + $0x3fc] sm:$0xf0]  ;;  %v2889_v47 = vld [vmem:[%s6288_s1 + $0x154] sm:$0xf0]  ;;  %v3072_v48 = vor.u32 %v4090_v35, %v3069_v38 }
  0x58   :  { %v4170_v43 = vld [vmem:[%s6288_s1 + $0x52c] sm:$0xf]  ;;  %v3389_v44 = vld [vmem:[%s6288_s1 + $0x53c] sm:$0xf0]  ;;  %1963 = vmatpush.bf16.msra.mxu0 %v2932_v30  ;;  %v3232_v49 = vor.u32 %v4130_v39, %v3229_v42  ;;  %v4085_v50 = vld [vmem:[%s6288_s1 + $0x284] sm:$0xf]  ;;  %v2892_v60 = vor.u32 %v4045_v46, %v2889_v47 }
  0x59   :  { %1976 = vmatpush.bf16.msra.mxu1 %v3092_v31  ;;  %v3049_v51 = vld [vmem:[%s6288_s1 + $0x294] sm:$0xf0]  ;;  %v4125_v52 = vld [vmem:[%s6288_s1 + $0x3c4] sm:$0xf]  ;;  %v3392_v53 = vor.u32 %v4170_v43, %v3389_v44  ;;  %v4240_v57 = vld [vmem:[%s6288_s1 + $0x75c] sm:$0xf] }
  0x5a   :  { %1989 = vmatpush.bf16.msra.mxu2 %v3252_v32  ;;  %v3209_v54 = vld [vmem:[%s6288_s1 + $0x3d4] sm:$0xf0]  ;;  %v4165_v55 = vld [vmem:[%s6288_s1 + $0x504] sm:$0xf]  ;;  %v3669_v58 = vld [vmem:[%s6288_s1 + $0x76c] sm:$0xf0]  ;;  %v3052_v0 = vor.u32 %v4085_v50, %v3049_v51 }
  0x5b   :  { %2002 = vmatpush.bf16.msra.mxu3 %v3412_v36  ;;  %v3369_v56 = vld [vmem:[%s6288_s1 + $0x514] sm:$0xf0]  ;;  %v4280_v59 = vld [vmem:[%s6288_s1 + $0x89c] sm:$0xf]  ;;  %v3829_v61 = vld [vmem:[%s6288_s1 + $0x8ac] sm:$0xf0]  ;;  %v3212_v1 = vor.u32 %v4125_v52, %v3209_v54  ;;  %v3672_v5 = vor.u32 %v4240_v57, %v3669_v58 }
  0x5c   :  { %1964 = vmatpush.bf16.msra.mxu0 %v2912_v45  ;;  %v2875_v62 = vld [vmem:[%s6288_s1 + $0x120] sm:$0xf]  ;;  %v4043_v63 = vld [vmem:[%s6288_s1 + $0x130] sm:$0xf0]  ;;  %v3372_v4 = vor.u32 %v4165_v55, %v3369_v56  ;;  %v3832_v6 = vor.u32 %v4280_v59, %v3829_v61  ;;  %v3649_v9 = vld [vmem:[%s6288_s1 + $0x744] sm:$0xf0] }
  0x5d   :  { %1977 = vmatpush.bf16.msra.mxu1 %v3072_v48  ;;  %v3035_v2 = vld [vmem:[%s6288_s1 + $0x260] sm:$0xf]  ;;  %v4083_v3 = vld [vmem:[%s6288_s1 + $0x270] sm:$0xf0]  ;;  %v2876_v7 = vor.u32 %v4043_v63, %v2875_v62  ;;  %v3809_v12 = vld [vmem:[%s6288_s1 + $0x884] sm:$0xf0] }
  0x5e   :  { %1990 = vmatpush.bf16.msra.mxu2 %v3232_v49  ;;  %v4235_v8 = vld [vmem:[%s6288_s1 + $0x734] sm:$0xf]  ;;  %v3036_v11 = vor.u32 %v4083_v3, %v3035_v2  ;;  %v2855_v13 = vld [vmem:[%s6288_s1 + $0xf8] sm:$0xf]  ;;  %v4038_v14 = vld [vmem:[%s6288_s1 + $0x108] sm:$0xf0] }
  0x5f   :  { %2003 = vmatpush.bf16.msra.mxu3 %v3392_v53  ;;  %v4275_v10 = vld [vmem:[%s6288_s1 + $0x874] sm:$0xf]  ;;  %v3015_v15 = vld [vmem:[%s6288_s1 + $0x238] sm:$0xf]  ;;  %v4078_v16 = vld [vmem:[%s6288_s1 + $0x248] sm:$0xf0]  ;;  %v3652_v17 = vor.u32 %v4235_v8, %v3649_v9  ;;  %v2856_v23 = vor.u32 %v4038_v14, %v2855_v13 }
  0x60   :  { %1965 = vmatpush.bf16.msra.mxu0 %v2892_v60  ;;  %v3812_v20 = vor.u32 %v4275_v10, %v3809_v12  ;;  %v4230_v24 = vld [vmem:[%s6288_s1 + $0x70c] sm:$0xf]  ;;  %v3629_v25 = vld [vmem:[%s6288_s1 + $0x71c] sm:$0xf0]  ;;  %v3016_v27 = vor.u32 %v4078_v16, %v3015_v15  ;;  %v2835_v29 = vld [vmem:[%s6288_s1 + $0xd0] sm:$0xf] }
  0x61   :  { %1978 = vmatpush.bf16.msra.mxu1 %v3052_v0  ;;  %v4270_v26 = vld [vmem:[%s6288_s1 + $0x84c] sm:$0xf]  ;;  %v3789_v28 = vld [vmem:[%s6288_s1 + $0x85c] sm:$0xf0]  ;;  %v4033_v30 = vld [vmem:[%s6288_s1 + $0xe0] sm:$0xf0]  ;;  %v3632_v33 = vor.u32 %v4230_v24, %v3629_v25 }
  0x62   :  { %1991 = vmatpush.bf16.msra.mxu2 %v3212_v1  ;;  %v2995_v31 = vld [vmem:[%s6288_s1 + $0x210] sm:$0xf]  ;;  %v4073_v32 = vld [vmem:[%s6288_s1 + $0x220] sm:$0xf0]  ;;  %v3792_v34 = vor.u32 %v4270_v26, %v3789_v28  ;;  %v2836_v35 = vor.u32 %v4033_v30, %v2835_v29  ;;  %v3609_v38 = vld [vmem:[%s6288_s1 + $0x6f4] sm:$0xf0] }
  0x63   :  { %2004 = vmatpush.bf16.msra.mxu3 %v3372_v4  ;;  %1966 = vmatmul.bf16.vlgmr.msra.gmra.mxu0 %v4683_v21  ;;  %v4225_v36 = vld [vmem:[%s6288_s1 + $0x6e4] sm:$0xf]  ;;  %v2996_v42 = vor.u32 %v4073_v32, %v2995_v31  ;;  %v3769_v43 = vld [vmem:[%s6288_s1 + $0x834] sm:$0xf0]  ;;  %v2815_v44 = vld [vmem:[%s6288_s1 + $0xa8] sm:$0xf] }
  0x64   :  { %2010 = vmatpush.bf16.msrb.mxu0 %v3672_v5  ;;  %1979 = vmatmul.bf16.vlgmr.msra.gmra.mxu1 %v4679_v18  ;;  %v4265_v39 = vld [vmem:[%s6288_s1 + $0x824] sm:$0xf]  ;;  %v4028_v45 = vld [vmem:[%s6288_s1 + $0xb8] sm:$0xf0]  ;;  %v2975_v46 = vld [vmem:[%s6288_s1 + $0x1e8] sm:$0xf]  ;;  %v3612_v48 = vor.u32 %v4225_v36, %v3609_v38 }
  0x65   :  { %2023 = vmatpush.bf16.msrb.mxu1 %v3832_v6  ;;  %1992 = vmatmul.bf16.vlgmr.msra.gmra.mxu2 %v4685_v22  ;;  %v4068_v47 = vld [vmem:[%s6288_s1 + $0x1f8] sm:$0xf0]  ;;  %v3772_v49 = vor.u32 %v4265_v39, %v3769_v43  ;;  %v2816_v50 = vor.u32 %v4028_v45, %v2815_v44  ;;  %v3589_v52 = vld [vmem:[%s6288_s1 + $0x6cc] sm:$0xf0]  ;;  %v2795_v56 = vld [vmem:[%s6288_s1 + $0x80] sm:$0xf] }
  0x66   :  { %2036 = vmatpush.bf16.msrb.mxu2 %v2876_v7  ;;  %2005 = vmatmul.bf16.vlgmr.msra.gmra.mxu3 %v4843_v40  ;;  %v4220_v51 = vld [vmem:[%s6288_s1 + $0x6bc] sm:$0xf]  ;;  %v2976_v54 = vor.u32 %v4068_v47, %v2975_v46  ;;  %v3749_v55 = vld [vmem:[%s6288_s1 + $0x80c] sm:$0xf0]  ;;  %v4023_v57 = vld [vmem:[%s6288_s1 + $0x90] sm:$0xf0] }
  0x67   :  { %2049 = vmatpush.bf16.msrb.mxu3 %v3036_v11  ;;  %v4260_v53 = vld [vmem:[%s6288_s1 + $0x7fc] sm:$0xf]  ;;  %v2955_v58 = vld [vmem:[%s6288_s1 + $0x1c0] sm:$0xf]  ;;  %v4063_v59 = vld [vmem:[%s6288_s1 + $0x1d0] sm:$0xf0]  ;;  %v3592_v60 = vor.u32 %v4220_v51, %v3589_v52  ;;  %v2796_v62 = vor.u32 %v4023_v57, %v2795_v56 }
  0x68   :  { %2011 = vmatpush.bf16.msrb.mxu0 %v3652_v17  ;;  %v3752_v61 = vor.u32 %v4260_v53, %v3749_v55  ;;  %v4215_v63 = vld [vmem:[%s6288_s1 + $0x694] sm:$0xf]  ;;  %v3569_v0 = vld [vmem:[%s6288_s1 + $0x6a4] sm:$0xf0]  ;;  %v2956_v2 = vor.u32 %v4063_v59, %v2955_v58  ;;  %v2775_v4 = vld [vmem:[%s6288_s1 + $0x58] sm:$0xf] }
  0x69   :  { %2024 = vmatpush.bf16.msrb.mxu1 %v3812_v20  ;;  %v4255_v1 = vld [vmem:[%s6288_s1 + $0x7d4] sm:$0xf]  ;;  %v3729_v3 = vld [vmem:[%s6288_s1 + $0x7e4] sm:$0xf0]  ;;  %v4018_v5 = vld [vmem:[%s6288_s1 + $0x68] sm:$0xf0]  ;;  %v3572_v8 = vor.u32 %v4215_v63, %v3569_v0 }
  0x6a   :  { %2037 = vmatpush.bf16.msrb.mxu2 %v2856_v23  ;;  %v2935_v6 = vld [vmem:[%s6288_s1 + $0x198] sm:$0xf]  ;;  %v4058_v7 = vld [vmem:[%s6288_s1 + $0x1a8] sm:$0xf0]  ;;  %v3732_v9 = vor.u32 %v4255_v1, %v3729_v3  ;;  %v2776_v10 = vor.u32 %v4018_v5, %v2775_v4  ;;  %v3549_v12 = vld [vmem:[%s6288_s1 + $0x67c] sm:$0xf0] }
  0x6b   :  { %2050 = vmatpush.bf16.msrb.mxu3 %v3016_v27  ;;  %v4210_v11 = vld [vmem:[%s6288_s1 + $0x66c] sm:$0xf]  ;;  %v2936_v14 = vor.u32 %v4058_v7, %v2935_v6  ;;  %v3709_v15 = vld [vmem:[%s6288_s1 + $0x7bc] sm:$0xf0]  ;;  %v2755_v16 = vld [vmem:[%s6288_s1 + $0x30] sm:$0xf] }
  0x6c   :  { %2012 = vmatpush.bf16.msrb.mxu0 %v3632_v33  ;;  %v4250_v13 = vld [vmem:[%s6288_s1 + $0x7ac] sm:$0xf]  ;;  %v4013_v17 = vld [vmem:[%s6288_s1 + $0x40] sm:$0xf0]  ;;  %v2915_v20 = vld [vmem:[%s6288_s1 + $0x170] sm:$0xf]  ;;  %v3552_v24 = vor.u32 %v4210_v11, %v3549_v12 }
  0x6d   :  { %2025 = vmatpush.bf16.msrb.mxu1 %v3792_v34  ;;  %v4053_v23 = vld [vmem:[%s6288_s1 + $0x180] sm:$0xf0]  ;;  %v3529_v26 = vld [vmem:[%s6288_s1 + $0x654] sm:$0xf0]  ;;  %v3712_v27 = vor.u32 %v4250_v13, %v3709_v15  ;;  %v2756_v28 = vor.u32 %v4013_v17, %v2755_v16  ;;  %v2735_v31 = vld [vmem:[%s6288_s1 + $0x8] sm:$0xf] }
  0x6e   :  { %2038 = vmatpush.bf16.msrb.mxu2 %v2836_v35  ;;  %v4205_v25 = vld [vmem:[%s6288_s1 + $0x644] sm:$0xf]  ;;  %v3689_v30 = vld [vmem:[%s6288_s1 + $0x794] sm:$0xf0]  ;;  %v2916_v32 = vor.u32 %v4053_v23, %v2915_v20  ;;  %v4008_v33 = vld [vmem:[%s6288_s1 + $0x18] sm:$0xf0] }
  0x6f   :  { %2051 = vmatpush.bf16.msrb.mxu3 %v2996_v42  ;;  %v4245_v29 = vld [vmem:[%s6288_s1 + $0x784] sm:$0xf]  ;;  %v2895_v34 = vld [vmem:[%s6288_s1 + $0x148] sm:$0xf]  ;;  %v4048_v35 = vld [vmem:[%s6288_s1 + $0x158] sm:$0xf0]  ;;  %v3532_v42 = vor.u32 %v4205_v25, %v3529_v26  ;;  %v2736_v47 = vor.u32 %v4008_v33, %v2735_v31 }
  0x70   :  { %2013 = vmatpush.bf16.msrb.mxu0 %v3612_v48  ;;  %v3195_v36 = vld [vmem:[%s6288_s1 + $0x3a0] sm:$0xf]  ;;  %v4123_v38 = vld [vmem:[%s6288_s1 + $0x3b0] sm:$0xf0]  ;;  %v3692_v46 = vor.u32 %v4245_v29, %v3689_v30  ;;  %v4118_v55 = vld [vmem:[%s6288_s1 + $0x388] sm:$0xf0] }
  0x71   :  { %2026 = vmatpush.bf16.msrb.mxu1 %v3772_v49  ;;  %v3355_v39 = vld [vmem:[%s6288_s1 + $0x4e0] sm:$0xf]  ;;  %v4163_v43 = vld [vmem:[%s6288_s1 + $0x4f0] sm:$0xf0]  ;;  %v3196_v51 = vor.u32 %v4123_v38, %v3195_v36  ;;  %v3335_v56 = vld [vmem:[%s6288_s1 + $0x4b8] sm:$0xf] }
  0x72   :  { %2039 = vmatpush.bf16.msrb.mxu2 %v2816_v50  ;;  %v3515_v44 = vld [vmem:[%s6288_s1 + $0x620] sm:$0xf]  ;;  %v4203_v45 = vld [vmem:[%s6288_s1 + $0x630] sm:$0xf0]  ;;  %v2896_v50 = vor.u32 %v4048_v35, %v2895_v34  ;;  %v3356_v52 = vor.u32 %v4163_v43, %v3355_v39  ;;  %v4158_v58 = vld [vmem:[%s6288_s1 + $0x4c8] sm:$0xf0] }
  0x73   :  { %2052 = vmatpush.bf16.msrb.mxu3 %v2976_v54  ;;  %v3675_v48 = vld [vmem:[%s6288_s1 + $0x760] sm:$0xf]  ;;  %v4243_v49 = vld [vmem:[%s6288_s1 + $0x770] sm:$0xf0]  ;;  %v3516_v53 = vor.u32 %v4203_v45, %v3515_v44  ;;  %v3175_v54 = vld [vmem:[%s6288_s1 + $0x378] sm:$0xf]  ;;  %v3336_v0 = vor.u32 %v4158_v58, %v3335_v56 }
  0x74   :  { %2014 = vmatpush.bf16.msrb.mxu0 %v3592_v60  ;;  %v3676_v57 = vor.u32 %v4243_v49, %v3675_v48  ;;  %v3495_v59 = vld [vmem:[%s6288_s1 + $0x5f8] sm:$0xf]  ;;  %v4198_v60 = vld [vmem:[%s6288_s1 + $0x608] sm:$0xf0]  ;;  %v3176_v63 = vor.u32 %v4118_v55, %v3175_v54  ;;  %v4113_v3 = vld [vmem:[%s6288_s1 + $0x360] sm:$0xf0] }
  0x75   :  { %2027 = vmatpush.bf16.msrb.mxu1 %v3752_v61  ;;  %v3655_v61 = vld [vmem:[%s6288_s1 + $0x738] sm:$0xf]  ;;  %v3496_v1 = vor.u32 %v4198_v60, %v3495_v59  ;;  %v3315_v4 = vld [vmem:[%s6288_s1 + $0x490] sm:$0xf]  ;;  %v4153_v6 = vld [vmem:[%s6288_s1 + $0x4a0] sm:$0xf0] }
  0x76   :  { %2040 = vmatpush.bf16.msrb.mxu2 %v2796_v62  ;;  %v4238_v62 = vld [vmem:[%s6288_s1 + $0x748] sm:$0xf0]  ;;  %v3475_v7 = vld [vmem:[%s6288_s1 + $0x5d0] sm:$0xf]  ;;  %v3316_v12 = vor.u32 %v4153_v6, %v3315_v4  ;;  %v4108_v15 = vld [vmem:[%s6288_s1 + $0x338] sm:$0xf0] }
  0x77   :  { %2053 = vmatpush.bf16.msrb.mxu3 %v2956_v2  ;;  %v3155_v2 = vld [vmem:[%s6288_s1 + $0x350] sm:$0xf]  ;;  %v3656_v5 = vor.u32 %v4238_v62, %v3655_v61  ;;  %v3295_v16 = vld [vmem:[%s6288_s1 + $0x468] sm:$0xf]  ;;  %v4148_v20 = vld [vmem:[%s6288_s1 + $0x478] sm:$0xf0] }
  0x78   :  { %2015 = vmatpush.bf16.msrb.mxu0 %v3572_v8  ;;  %v4193_v8 = vld [vmem:[%s6288_s1 + $0x5e0] sm:$0xf0]  ;;  %v3156_v11 = vor.u32 %v4113_v3, %v3155_v2  ;;  %v3455_v23 = vld [vmem:[%s6288_s1 + $0x5a8] sm:$0xf]  ;;  %v4228_v26 = vld [vmem:[%s6288_s1 + $0x6f8] sm:$0xf0] }
  0x79   :  { %2028 = vmatpush.bf16.msrb.mxu1 %v3732_v9  ;;  %v3635_v9 = vld [vmem:[%s6288_s1 + $0x710] sm:$0xf]  ;;  %v3476_v13 = vor.u32 %v4193_v8, %v3475_v7  ;;  %v3615_v25 = vld [vmem:[%s6288_s1 + $0x6e8] sm:$0xf]  ;;  %v3115_v30 = vld [vmem:[%s6288_s1 + $0x300] sm:$0xf] }
  0x7a   :  { %2041 = vmatpush.bf16.msrb.mxu2 %v2776_v10  ;;  %v4233_v10 = vld [vmem:[%s6288_s1 + $0x720] sm:$0xf0]  ;;  %v4103_v31 = vld [vmem:[%s6288_s1 + $0x310] sm:$0xf0]  ;;  %v3616_v33 = vor.u32 %v4228_v26, %v3615_v25  ;;  %v3435_v35 = vld [vmem:[%s6288_s1 + $0x580] sm:$0xf] }
  0x7b   :  { %2054 = vmatpush.bf16.msrb.mxu3 %v2936_v14  ;;  %v3135_v14 = vld [vmem:[%s6288_s1 + $0x328] sm:$0xf]  ;;  %v3636_v17 = vor.u32 %v4233_v10, %v3635_v9  ;;  %v4143_v34 = vld [vmem:[%s6288_s1 + $0x450] sm:$0xf0]  ;;  %v3595_v38 = vld [vmem:[%s6288_s1 + $0x6c0] sm:$0xf] }
  0x7c   :  { %2016 = vmatpush.bf16.msrb.mxu0 %v3552_v24  ;;  %v4188_v24 = vld [vmem:[%s6288_s1 + $0x5b8] sm:$0xf0]  ;;  %v4183_v36 = vld [vmem:[%s6288_s1 + $0x590] sm:$0xf0]  ;;  %v3095_v45 = vld [vmem:[%s6288_s1 + $0x2d8] sm:$0xf] }
  0x7d   :  { %2029 = vmatpush.bf16.msrb.mxu1 %v3712_v27  ;;  %v3136_v27 = vor.u32 %v4108_v15, %v3135_v14  ;;  %v3456_v29 = vor.u32 %v4188_v24, %v3455_v23  ;;  %v4223_v39 = vld [vmem:[%s6288_s1 + $0x6d0] sm:$0xf0]  ;;  %v3436_v44 = vor.u32 %v4183_v36, %v3435_v35  ;;  %v4138_v49 = vld [vmem:[%s6288_s1 + $0x428] sm:$0xf0]  ;;  %v4093_v58 = vld [vmem:[%s6288_s1 + $0x2c0] sm:$0xf0] }
  0x7e   :  { %2042 = vmatpush.bf16.msrb.mxu2 %v2756_v28  ;;  %v3296_v28 = vor.u32 %v4148_v20, %v3295_v16  ;;  %v3596_v48 = vor.u32 %v4223_v39, %v3595_v38  ;;  %v3235_v59 = vld [vmem:[%s6288_s1 + $0x3f0] sm:$0xf]  ;;  %v4133_v61 = vld [vmem:[%s6288_s1 + $0x400] sm:$0xf0]  ;;  %v3055_v3 = vld [vmem:[%s6288_s1 + $0x288] sm:$0xf] }
  0x7f   :  { %2055 = vmatpush.bf16.msrb.mxu3 %v2916_v32  ;;  %v3275_v32 = vld [vmem:[%s6288_s1 + $0x440] sm:$0xf]  ;;  %v3395_v62 = vld [vmem:[%s6288_s1 + $0x530] sm:$0xf]  ;;  %v4088_v4 = vld [vmem:[%s6288_s1 + $0x298] sm:$0xf0] }
  0x80   :  { %2017 = vmatpush.bf16.msrb.mxu0 %v3532_v42  ;;  %v3116_v42 = vor.u32 %v4103_v31, %v3115_v30  ;;  %v3276_v43 = vor.u32 %v4143_v34, %v3275_v32  ;;  %v3215_v7 = vld [vmem:[%s6288_s1 + $0x3c8] sm:$0xf]  ;;  %v4128_v8 = vld [vmem:[%s6288_s1 + $0x3d8] sm:$0xf0]  ;;  %v3835_v14 = vld [vmem:[%s6288_s1 + $0x8a0] sm:$0xf] }
  0x81   :  { %2030 = vmatpush.bf16.msrb.mxu1 %v3692_v46  ;;  %v4098_v46 = vld [vmem:[%s6288_s1 + $0x2e8] sm:$0xf0]  ;;  %v3375_v9 = vld [vmem:[%s6288_s1 + $0x508] sm:$0xf]  ;;  %v4283_v15 = vld [vmem:[%s6288_s1 + $0x8b0] sm:$0xf0]  ;;  %v3216_v25 = vor.u32 %v4128_v8, %v3215_v7 }
  0x82   :  { %2043 = vmatpush.bf16.msrb.mxu2 %v2736_v47  ;;  %v3255_v47 = vld [vmem:[%s6288_s1 + $0x418] sm:$0xf]  ;;  %v3096_v54 = vor.u32 %v4098_v46, %v3095_v45  ;;  %v4041_v16 = vld [vmem:[%s6288_s1 + $0x124] sm:$0xf]  ;;  %v3836_v30 = vor.u32 %v4283_v15, %v3835_v14  ;;  %v4278_v34 = vld [vmem:[%s6288_s1 + $0x888] sm:$0xf0] }
  0x83   :  { %2056 = vmatpush.bf16.msrb.mxu3 %v2896_v50  ;;  %2018 = vmatmul.bf16.vlgmr.msrb.gmra.mxu0 %v4845_v41  ;;  %v3415_v50 = vld [vmem:[%s6288_s1 + $0x558] sm:$0xf]  ;;  %v3256_v55 = vor.u32 %v4138_v49, %v3255_v47  ;;  %v4081_v23 = vld [vmem:[%s6288_s1 + $0x264] sm:$0xf]  ;;  %v4036_v35 = vld [vmem:[%s6288_s1 + $0xfc] sm:$0xf] }
  0x84   :  { %2062 = vmatpush.bf16.msra.mxu0 %v3196_v51  ;;  %2031 = vmatmul.bf16.vlgmr.msrb.gmra.mxu1 %v4835_v37  ;;  %v4178_v51 = vld [vmem:[%s6288_s1 + $0x568] sm:$0xf0]  ;;  %v2877_v20 = vld [vmem:[%s6288_s1 + $0x134] sm:$0xf0]  ;;  %v2857_v38 = vld [vmem:[%s6288_s1 + $0x10c] sm:$0xf0] }
  0x85   :  { %2075 = vmatpush.bf16.msra.mxu1 %v3356_v52  ;;  %2044 = vmatmul.bf16.vlgmr.msrb.gmra.mxu2 %v4681_v19  ;;  %v3575_v52 = vld [vmem:[%s6288_s1 + $0x698] sm:$0xf]  ;;  %v3416_v56 = vor.u32 %v4178_v51, %v3415_v50  ;;  %v2880_v31 = vor.u32 %v4041_v16, %v2877_v20  ;;  %v4076_v39 = vld [vmem:[%s6288_s1 + $0x23c] sm:$0xf]  ;;  %v2860_v46 = vor.u32 %v4036_v35, %v2857_v38  ;;  %v4273_v49 = vld [vmem:[%s6288_s1 + $0x860] sm:$0xf0] }
  0x86   :  { %2088 = vmatpush.bf16.msra.mxu2 %v3516_v53  ;;  %2057 = vmatmul.bf16.vlgmr.msrb.gmra.mxu3 %v4683_v21  ;;  %v4218_v53 = vld [vmem:[%s6288_s1 + $0x6a8] sm:$0xf0]  ;;  %v3037_v24 = vld [vmem:[%s6288_s1 + $0x274] sm:$0xf0]  ;;  %v4031_v50 = vld [vmem:[%s6288_s1 + $0xd4] sm:$0xf] }
  0x87   :  { %2101 = vmatpush.bf16.msra.mxu3 %v3676_v57  ;;  %v3075_v57 = vld [vmem:[%s6288_s1 + $0x2b0] sm:$0xf]  ;;  %v3576_v60 = vor.u32 %v4218_v53, %v3575_v52  ;;  %v3040_v32 = vor.u32 %v4081_v23, %v3037_v24  ;;  %v2837_v52 = vld [vmem:[%s6288_s1 + $0xe4] sm:$0xf0]  ;;  %v4071_v53 = vld [vmem:[%s6288_s1 + $0x214] sm:$0xf] }
  0x88   :  { %2063 = vmatpush.bf16.msra.mxu0 %v3176_v63  ;;  %v4173_v63 = vld [vmem:[%s6288_s1 + $0x540] sm:$0xf0]  ;;  %v3076_v2 = vor.u32 %v4093_v58, %v3075_v57  ;;  %v2840_v58 = vor.u32 %v4031_v50, %v2837_v52  ;;  %v2957_v14 = vld [vmem:[%s6288_s1 + $0x1d4] sm:$0xf0]  ;;  %v2917_v50 = vld [vmem:[%s6288_s1 + $0x184] sm:$0xf0] }
  0x89   :  { %2076 = vmatpush.bf16.msra.mxu1 %v3336_v0  ;;  %v3555_v0 = vld [vmem:[%s6288_s1 + $0x670] sm:$0xf]  ;;  %v3396_v6 = vor.u32 %v4173_v63, %v3395_v62  ;;  %v4026_v62 = vld [vmem:[%s6288_s1 + $0xac] sm:$0xf]  ;;  %v5508_v15 = vld [vmem:[%s6289_s2] sm:$0x1f] }
  0x8a   :  { %2089 = vmatpush.bf16.msra.mxu2 %v3496_v1  ;;  %v4213_v1 = vld [vmem:[%s6288_s1 + $0x680] sm:$0xf0]  ;;  %v3735_v23 = vld [vmem:[%s6288_s1 + $0x7d8] sm:$0xf]  ;;  %v3077_v52 = vld [vmem:[%s6288_s1 + $0x2c4] sm:$0xf0] }
  0x8b   :  { %2102 = vmatpush.bf16.msra.mxu3 %v3656_v5  ;;  %v3236_v5 = vor.u32 %v4133_v61, %v3235_v59  ;;  %v3556_v10 = vor.u32 %v4213_v1, %v3555_v0  ;;  %v4268_v61 = vld [vmem:[%s6288_s1 + $0x838] sm:$0xf0]  ;;  %v2817_v0 = vld [vmem:[%s6288_s1 + $0xbc] sm:$0xf0]  ;;  %v4066_v1 = vld [vmem:[%s6288_s1 + $0x1ec] sm:$0xf] }
  0x8c   :  { %2064 = vmatpush.bf16.msra.mxu0 %v3156_v11  ;;  %v4168_v11 = vld [vmem:[%s6288_s1 + $0x518] sm:$0xf0]  ;;  %v2820_v7 = vor.u32 %v4026_v62, %v2817_v0  ;;  %v4101_v16 = vld [vmem:[%s6288_s1 + $0x304] sm:$0xf]  ;;  %v2897_v0 = vld [vmem:[%s6288_s1 + $0x15c] sm:$0xf0] }
  0x8d   :  { %2077 = vmatpush.bf16.msra.mxu1 %v3316_v12  ;;  %v3535_v12 = vld [vmem:[%s6288_s1 + $0x648] sm:$0xf]  ;;  %v3376_v26 = vor.u32 %v4168_v11, %v3375_v9  ;;  %v4263_v9 = vld [vmem:[%s6288_s1 + $0x810] sm:$0xf0]  ;;  %v2797_v11 = vld [vmem:[%s6288_s1 + $0x94] sm:$0xf0] }
  0x8e   :  { %2090 = vmatpush.bf16.msra.mxu2 %v3476_v13  ;;  %v4208_v13 = vld [vmem:[%s6288_s1 + $0x658] sm:$0xf0]  ;;  %s4354_s0 = smov [#allocation2]   ;;  %s2716_s19 = sshll.u32 %s6292_s5, 4  ;;  %s2717_s19 = int_to_ptr.hbm [resolvable:$true] %s2716_s19 }
  0x8f   :  { %2103 = vmatpush.bf16.msra.mxu3 %v3636_v17  ;;  %v3056_v17 = vor.u32 %v4088_v4, %v3055_v3  ;;  %v4106_v3 = vld [vmem:[%s6288_s1 + $0x32c] sm:$0xf]  ;;  %v3137_v4 = vld [vmem:[%s6288_s1 + $0x33c] sm:$0xf0]  ;;  %s2714_s16 = sshll.u32 %s4354_s0, 4  ;;  %s2715_s16 = int_to_ptr.vmem [resolvable:$true] %s2714_s16 }
  0x90   :  { %2065 = vmatpush.bf16.msra.mxu0 %v3136_v27  ;;  %v4121_v27 = vld [vmem:[%s6288_s1 + $0x3a4] sm:$0xf] }
  0x91   :  { %2078 = vmatpush.bf16.msra.mxu1 %v3296_v28  ;;  %v3197_v28 = vld [vmem:[%s6288_s1 + $0x3b4] sm:$0xf0] }
  0x92   :  { %2091 = vmatpush.bf16.msra.mxu2 %v3456_v29  ;;  %v3536_v29 = vor.u32 %v4208_v13, %v3535_v12  ;;  %v3200_v36 = vor.u32 %v4121_v27, %v3197_v28  ;;  %v3140_v12 = vor.u32 %v4106_v3, %v3137_v4  ;;  %v4061_v13 = vld [vmem:[%s6288_s1 + $0x1c4] sm:$0xf]  ;;  %v4016_v27 = vld [vmem:[%s6288_s1 + $0x5c] sm:$0xf]  ;;  %v363_v28 = vperm.slane %v5508_v15, 0 }
  0x93   :  { %2104 = vmatpush.bf16.msra.mxu3 %v3616_v33  ;;  %v3815_v33 = vld [vmem:[%s6288_s1 + $0x878] sm:$0xf]  ;;  %v4161_v4 = vld [vmem:[%s6288_s1 + $0x4e4] sm:$0xf] }
  0x94   :  { %2066 = vmatpush.bf16.msra.mxu0 %v3116_v42  ;;  %v3017_v42 = vld [vmem:[%s6288_s1 + $0x24c] sm:$0xf0]  ;;  %v3816_v45 = vor.u32 %v4278_v34, %v3815_v33  ;;  %v4096_v33 = vld [vmem:[%s6288_s1 + $0x2dc] sm:$0xf] }
  0x95   :  { %2079 = vmatpush.bf16.msra.mxu1 %v3276_v43  ;;  %v4116_v43 = vld [vmem:[%s6288_s1 + $0x37c] sm:$0xf]  ;;  %v3020_v47 = vor.u32 %v4076_v39, %v3017_v42  ;;  %v3097_v34 = vld [vmem:[%s6288_s1 + $0x2ec] sm:$0xf0] }
  0x96   :  { %2092 = vmatpush.bf16.msra.mxu2 %v3436_v44  ;;  %v3177_v44 = vld [vmem:[%s6288_s1 + $0x38c] sm:$0xf0] }
  0x97   :  { %2105 = vmatpush.bf16.msra.mxu3 %v3596_v48  ;;  %v3795_v48 = vld [vmem:[%s6288_s1 + $0x850] sm:$0xf]  ;;  %v3180_v51 = vor.u32 %v4116_v43, %v3177_v44  ;;  %v4253_v44 = vld [vmem:[%s6288_s1 + $0x7c0] sm:$0xf0] }
  0x98   :  { %2067 = vmatpush.bf16.msra.mxu0 %v3096_v54  ;;  %v2997_v54 = vld [vmem:[%s6288_s1 + $0x224] sm:$0xf0]  ;;  %v3796_v57 = vor.u32 %v4273_v49, %v3795_v48  ;;  %v3715_v43 = vld [vmem:[%s6288_s1 + $0x7b0] sm:$0xf]  ;;  %v4051_v49 = vld [vmem:[%s6288_s1 + $0x174] sm:$0xf] }
  0x99   :  { %2080 = vmatpush.bf16.msra.mxu1 %v3256_v55  ;;  %v4111_v55 = vld [vmem:[%s6288_s1 + $0x354] sm:$0xf]  ;;  %v3000_v59 = vor.u32 %v4071_v53, %v2997_v54  ;;  %v2757_v48 = vld [vmem:[%s6288_s1 + $0x44] sm:$0xf0]  ;;  %v3716_v54 = vor.u32 %v4253_v44, %v3715_v43 }
  0x9a   :  { %2093 = vmatpush.bf16.msra.mxu2 %v3416_v56  ;;  %v3157_v56 = vld [vmem:[%s6288_s1 + $0x364] sm:$0xf0]  ;;  %v4151_v44 = vld [vmem:[%s6288_s1 + $0x494] sm:$0xf] }
  0x9b   :  { %2106 = vmatpush.bf16.msra.mxu3 %v3576_v60  ;;  %v3775_v60 = vld [vmem:[%s6288_s1 + $0x828] sm:$0xf]  ;;  %v3160_v63 = vor.u32 %v4111_v55, %v3157_v56  ;;  %v4248_v56 = vld [vmem:[%s6288_s1 + $0x798] sm:$0xf0] }
  0x9c   :  { %2068 = vmatpush.bf16.msra.mxu0 %v3076_v2  ;;  %v2977_v2 = vld [vmem:[%s6288_s1 + $0x1fc] sm:$0xf0]  ;;  %v3695_v55 = vld [vmem:[%s6288_s1 + $0x788] sm:$0xf] }
  0x9d   :  { %2081 = vmatpush.bf16.msra.mxu1 %v3236_v5  ;;  %v3776_v5 = vor.u32 %v4268_v61, %v3775_v60  ;;  %v2980_v8 = vor.u32 %v4066_v1, %v2977_v2  ;;  %v2737_v60 = vld [vmem:[%s6288_s1 + $0x1c] sm:$0xf0]  ;;  %v4046_v61 = vld [vmem:[%s6288_s1 + $0x14c] sm:$0xf] }
  0x9e   :  { %2094 = vmatpush.bf16.msra.mxu2 %v3396_v6  ;;  %v3755_v6 = vld [vmem:[%s6288_s1 + $0x800] sm:$0xf]  ;;  %v4086_v1 = vld [vmem:[%s6288_s1 + $0x28c] sm:$0xf] }
  0x9f   :  { %2107 = vmatpush.bf16.msra.mxu3 %v3556_v10  ;;  %v4021_v10 = vld [vmem:[%s6288_s1 + $0x84] sm:$0xf]  ;;  %v3756_v20 = vor.u32 %v4263_v9, %v3755_v6  ;;  %v3057_v2 = vld [vmem:[%s6288_s1 + $0x29c] sm:$0xf0]  ;;  %v3517_v9 = vld [vmem:[%s6288_s1 + $0x634] sm:$0xf0] }
  0xa0   :  { %2069 = vmatpush.bf16.msra.mxu0 %v3056_v17  ;;  %v3117_v17 = vld [vmem:[%s6288_s1 + $0x314] sm:$0xf0]  ;;  %v2800_v24 = vor.u32 %v4021_v10, %v2797_v11  ;;  %v4201_v6 = vld [vmem:[%s6288_s1 + $0x624] sm:$0xf] }
  0xa1   :  { %2082 = vmatpush.bf16.msra.mxu1 %v3216_v25  ;;  %v2960_v25 = vor.u32 %v4061_v13, %v2957_v14  ;;  %v1876_v38 = vpop.f32.mrf.mxu1  ;;  %v4241_v10 = vld [vmem:[%s6288_s1 + $0x764] sm:$0xf]  ;;  %v3677_v11 = vld [vmem:[%s6288_s1 + $0x774] sm:$0xf0] }
  0xa2   :  { %2095 = vmatpush.bf16.msra.mxu2 %v3376_v26  ;;  %v4258_v26 = vld [vmem:[%s6288_s1 + $0x7e8] sm:$0xf0] }
  0xa3   :  { %2108 = vmatpush.bf16.msra.mxu3 %v3536_v29  ;;  %2070 = vmatmul.bf16.vlgmr.msra.gmra.mxu0 %v4679_v18  ;;  %v3120_v29 = vor.u32 %v4101_v16, %v3117_v17  ;;  %v3736_v35 = vor.u32 %v4258_v26, %v3735_v23  ;;  %v2900_v17 = vor.u32 %v4046_v61, %v2897_v0  ;;  %v3837_v23 = vld [vmem:[%s6288_s1 + $0x8b4] sm:$0xf0]  ;;  %v3457_v61 = vld [vmem:[%s6288_s1 + $0x5bc] sm:$0xf0]  ;;  %v4266_v0 = vld [vmem:[%s6288_s1 + $0x82c] sm:$0xf] }
  0xa4   :  { %2114 = vmatpush.bf16.msrb.mxu0 %v3836_v30  ;;  %2083 = vmatmul.bf16.vlgmr.msra.gmra.mxu1 %v4685_v22  ;;  %v2777_v30 = vld [vmem:[%s6288_s1 + $0x6c] sm:$0xf0]  ;;  %v3520_v26 = vor.u32 %v4201_v6, %v3517_v9  ;;  %v4181_v9 = vld [vmem:[%s6288_s1 + $0x584] sm:$0xf] }
  0xa5   :  { %2127 = vmatpush.bf16.msrb.mxu1 %v2880_v31  ;;  %2096 = vmatmul.bf16.vlgmr.msra.gmra.mxu2 %v4843_v40  ;;  %v4056_v31 = vld [vmem:[%s6288_s1 + $0x19c] sm:$0xf]  ;;  %v2780_v39 = vor.u32 %v4016_v27, %v2777_v30  ;;  %v3680_v27 = vor.u32 %v4241_v10, %v3677_v11 }
  0xa6   :  { %2140 = vmatpush.bf16.msrb.mxu2 %v3040_v32  ;;  %2109 = vmatmul.bf16.vlgmr.msra.gmra.mxu3 %v4845_v41  ;;  %v2937_v32 = vld [vmem:[%s6288_s1 + $0x1ac] sm:$0xf0]  ;;  %v4196_v30 = vld [vmem:[%s6288_s1 + $0x5fc] sm:$0xf] }
  0xa7   :  { %2153 = vmatpush.bf16.msrb.mxu3 %v3200_v36  ;;  %v1863_v36 = vpop.f32.mrf.mxu0  ;;  %v2940_v42 = vor.u32 %v4056_v31, %v2937_v32  ;;  %v3497_v32 = vld [vmem:[%s6288_s1 + $0x60c] sm:$0xf0] }
  0xa8   :  { %2115 = vmatpush.bf16.msrb.mxu0 %v3816_v45  ;;  %v4011_v45 = vld [vmem:[%s6288_s1 + $0x34] sm:$0xf]  ;;  %v1889_v62 = vpop.f32.mrf.mxu2 }
  0xa9   :  { %2128 = vmatpush.bf16.msrb.mxu1 %v2860_v46  ;;  %v1864_v46 = vadd.f32 %v1863_v36, %v363_v28  ;;  %v1878_v13 = vpop.f32.mrf.mxu1  ;;  %v4156_v28 = vld [vmem:[%s6288_s1 + $0x4bc] sm:$0xf]  ;;  %v3817_v36 = vld [vmem:[%s6288_s1 + $0x88c] sm:$0xf0] }
  0xaa   :  { %2141 = vmatpush.bf16.msrb.mxu2 %v3020_v47  ;;  %v3100_v47 = vor.u32 %v4096_v33, %v3097_v34  ;;  %v4236_v33 = vld [vmem:[%s6288_s1 + $0x73c] sm:$0xf]  ;;  %v3657_v34 = vld [vmem:[%s6288_s1 + $0x74c] sm:$0xf0]  ;;  %v4221_v13 = vld [vmem:[%s6288_s1 + $0x6c4] sm:$0xf] }
  0xab   :  { %2154 = vmatpush.bf16.msrb.mxu3 %v3180_v51  ;;  %v4091_v51 = vld [vmem:[%s6288_s1 + $0x2b4] sm:$0xf]  ;;  %v1877_v53 = vadd.f32 %v1876_v38, %v1864_v46  ;;  %v3660_v43 = vor.u32 %v4236_v33, %v3657_v34  ;;  %v3577_v33 = vld [vmem:[%s6288_s1 + $0x6ac] sm:$0xf0] }
  0xac   :  { %2116 = vmatpush.bf16.msrb.mxu0 %v3796_v57  ;;  %v2760_v57 = vor.u32 %v4011_v45, %v2757_v48  ;;  %v3317_v45 = vld [vmem:[%s6288_s1 + $0x4a4] sm:$0xf0]  ;;  %v4191_v46 = vld [vmem:[%s6288_s1 + $0x5d4] sm:$0xf] }
  0xad   :  { %2129 = vmatpush.bf16.msrb.mxu1 %v2840_v58  ;;  %v2920_v58 = vor.u32 %v4051_v49, %v2917_v50  ;;  %v1890_v3 = vadd.f32 %v1889_v62, %v1877_v53  ;;  %v3477_v49 = vld [vmem:[%s6288_s1 + $0x5e4] sm:$0xf0]  ;;  %v4231_v50 = vld [vmem:[%s6288_s1 + $0x714] sm:$0xf]  ;;  %v4226_v62 = vld [vmem:[%s6288_s1 + $0x6ec] sm:$0xf] }
  0xae   :  { %2142 = vmatpush.bf16.msrb.mxu2 %v3000_v59  ;;  %v4006_v59 = vld [vmem:[%s6288_s1 + $0xc] sm:$0xf]  ;;  %v3797_v53 = vld [vmem:[%s6288_s1 + $0x864] sm:$0xf0] }
  0xaf   :  { %2155 = vmatpush.bf16.msrb.mxu3 %v3160_v63  ;;  %v3080_v63 = vor.u32 %v4091_v51, %v3077_v52  ;;  %v2740_v16 = vor.u32 %v4006_v59, %v2737_v60  ;;  %v3637_v51 = vld [vmem:[%s6288_s1 + $0x724] sm:$0xf0]  ;;  %v4271_v52 = vld [vmem:[%s6288_s1 + $0x854] sm:$0xf]  ;;  %v4186_v59 = vld [vmem:[%s6288_s1 + $0x5ac] sm:$0xf] }
  0xb0   :  { %2117 = vmatpush.bf16.msrb.mxu0 %v3776_v5  ;;  %v3357_v5 = vld [vmem:[%s6288_s1 + $0x4f4] sm:$0xf0]  ;;  %v1891_v38 = vpop.f32.mrf.mxu2  ;;  %v3800_v60 = vor.u32 %v4271_v52, %v3797_v53  ;;  %v4251_v52 = vld [vmem:[%s6288_s1 + $0x7b4] sm:$0xf]  ;;  %v3717_v53 = vld [vmem:[%s6288_s1 + $0x7c4] sm:$0xf0] }
  0xb1   :  { %2130 = vmatpush.bf16.msrb.mxu1 %v2820_v7  ;;  %v1902_v7 = vpop.f32.mrf.mxu3 }
  0xb2   :  { %2143 = vmatpush.bf16.msrb.mxu2 %v2980_v8  ;;  %v3696_v8 = vor.u32 %v4248_v56, %v3695_v55  ;;  %v5607_v14 = vadd.f32 %v1902_v7, %v1890_v3  ;;  %v3480_v55 = vor.u32 %v4191_v46, %v3477_v49  ;;  %v3640_v56 = vor.u32 %v4231_v50, %v3637_v51  ;;  %v4141_v7 = vld [vmem:[%s6288_s1 + $0x444] sm:$0xf]  ;;  %v3237_v46 = vld [vmem:[%s6288_s1 + $0x404] sm:$0xf0]  ;;  %v4211_v50 = vld [vmem:[%s6288_s1 + $0x674] sm:$0xf] }
  0xb3   :  { %2156 = vmatpush.bf16.msrb.mxu3 %v3140_v12  ;;  %v1865_v12 = vpop.f32.mrf.mxu0  ;;  %v3397_v49 = vld [vmem:[%s6288_s1 + $0x544] sm:$0xf0] }
  0xb4   :  { %2118 = vmatpush.bf16.msrb.mxu0 %v3756_v20  ;;  %v4281_v20 = vld [vmem:[%s6288_s1 + $0x8a4] sm:$0xf]  ;;  %v3437_v12 = vld [vmem:[%s6288_s1 + $0x594] sm:$0xf0]  ;;  %v3557_v51 = vld [vmem:[%s6288_s1 + $0x684] sm:$0xf0] }
  0xb5   :  { %2131 = vmatpush.bf16.msrb.mxu1 %v2800_v24  ;;  %v3060_v24 = vor.u32 %v4086_v1, %v3057_v2  ;;  %v3840_v31 = vor.u32 %v4281_v20, %v3837_v23  ;;  %v3777_v1 = vld [vmem:[%s6288_s1 + $0x83c] sm:$0xf0] }
  0xb6   :  { %2144 = vmatpush.bf16.msrb.mxu2 %v2960_v25  ;;  %v3360_v25 = vor.u32 %v4161_v4, %v3357_v5  ;;  %v3460_v5 = vor.u32 %v4186_v59, %v3457_v61  ;;  %v3780_v11 = vor.u32 %v4266_v0, %v3777_v1  ;;  %v4166_v59 = vld [vmem:[%s6288_s1 + $0x50c] sm:$0xf]  ;;  %v3537_v0 = vld [vmem:[%s6288_s1 + $0x65c] sm:$0xf0] }
  0xb7   :  { %2157 = vmatpush.bf16.msrb.mxu3 %v3120_v29  ;;  %v3337_v29 = vld [vmem:[%s6288_s1 + $0x4cc] sm:$0xf0]  ;;  %v4206_v61 = vld [vmem:[%s6288_s1 + $0x64c] sm:$0xf] }
  0xb8   :  { %2119 = vmatpush.bf16.msrb.mxu0 %v3736_v35  ;;  %v4276_v35 = vld [vmem:[%s6288_s1 + $0x87c] sm:$0xf]  ;;  %v4246_v1 = vld [vmem:[%s6288_s1 + $0x78c] sm:$0xf] }
  0xb9   :  { %2132 = vmatpush.bf16.msrb.mxu1 %v2780_v39  ;;  %v3340_v39 = vor.u32 %v4156_v28, %v3337_v29  ;;  %v3820_v48 = vor.u32 %v4276_v35, %v3817_v36  ;;  %v4176_v28 = vld [vmem:[%s6288_s1 + $0x55c] sm:$0xf]  ;;  %v3737_v36 = vld [vmem:[%s6288_s1 + $0x7ec] sm:$0xf0] }
  0xba   :  { %2145 = vmatpush.bf16.msrb.mxu2 %v2940_v42  ;;  %v3500_v42 = vor.u32 %v4196_v30, %v3497_v32  ;;  %v4216_v32 = vld [vmem:[%s6288_s1 + $0x69c] sm:$0xf] }
  0xbb   :  { %2158 = vmatpush.bf16.msrb.mxu3 %v3100_v47  ;;  %v1904_v47 = vpop.f32.mrf.mxu3  ;;  %v4256_v35 = vld [vmem:[%s6288_s1 + $0x7dc] sm:$0xf] }
  0xbc   :  { %2120 = vmatpush.bf16.msrb.mxu0 %v3716_v54  ;;  %v3320_v54 = vor.u32 %v4151_v44, %v3317_v45  ;;  %v3580_v44 = vor.u32 %v4216_v32, %v3577_v33  ;;  %v4131_v45 = vld [vmem:[%s6288_s1 + $0x3f4] sm:$0xf]  ;;  %v2843_v33 = vld [vmem:[%s6288_s1 + $0xd8] sm:$0xf] }
  0xbd   :  { %2133 = vmatpush.bf16.msrb.mxu1 %v2760_v57  ;;  %v4146_v57 = vld [vmem:[%s6288_s1 + $0x46c] sm:$0xf]  ;;  %v4171_v47 = vld [vmem:[%s6288_s1 + $0x534] sm:$0xf] }
  0xbe   :  { %2146 = vmatpush.bf16.msrb.mxu2 %v2920_v58  ;;  %v3297_v58 = vld [vmem:[%s6288_s1 + $0x47c] sm:$0xf0] }
  0xbf   :  { %2159 = vmatpush.bf16.msrb.mxu3 %v3080_v63  ;;  %v3617_v63 = vld [vmem:[%s6288_s1 + $0x6fc] sm:$0xf0]  ;;  %v3300_v2 = vor.u32 %v4146_v57, %v3297_v58  ;;  %v3400_v57 = vor.u32 %v4171_v47, %v3397_v49  ;;  %v3560_v58 = vor.u32 %v4211_v50, %v3557_v51  ;;  %v4114_v47 = vld [vmem:[%s6288_s1 + $0x368] sm:$0xf0] }
  0xc0   :  { %2121 = vmatpush.bf16.msrb.mxu0 %v3696_v8  ;;  %v1915_v3 = vpop.f32.mrf.mxu0  ;;  %v3620_v6 = vor.u32 %v4226_v62, %v3617_v63  ;;  %v3277_v8 = vld [vmem:[%s6288_s1 + $0x454] sm:$0xf0]  ;;  %v3720_v63 = vor.u32 %v4251_v52, %v3717_v53  ;;  %v4154_v49 = vld [vmem:[%s6288_s1 + $0x4a8] sm:$0xf0]  ;;  %v2823_v53 = vld [vmem:[%s6288_s1 + $0xb0] sm:$0xf] }
  0xc1   :  { %2134 = vmatpush.bf16.msrb.mxu1 %v2740_v16  ;;  %v1928_v4 = vpop.f32.mrf.mxu1  ;;  %v1916_v10 = vadd.f32 %v1915_v3, %v5607_v14  ;;  %v3597_v16 = vld [vmem:[%s6288_s1 + $0x6d4] sm:$0xf0]  ;;  %v3280_v23 = vor.u32 %v4141_v7, %v3277_v8  ;;  %v2883_v3 = vld [vmem:[%s6288_s1 + $0x128] sm:$0xf]  ;;  %v4084_v7 = vld [vmem:[%s6288_s1 + $0x278] sm:$0xf0] }
  0xc2   :  { %2147 = vmatpush.bf16.msrb.mxu2 %v2900_v17  ;;  %v4261_v17 = vld [vmem:[%s6288_s1 + $0x804] sm:$0xf]  ;;  %v3757_v14 = vld [vmem:[%s6288_s1 + $0x814] sm:$0xf0]  ;;  %v3203_v8 = vld [vmem:[%s6288_s1 + $0x3a8] sm:$0xf] }
  0xc3   :  { %2160 = vmatpush.bf16.msrb.mxu3 %v3060_v24  ;;  %2122 = vmatmul.bf16.vlgmr.msrb.gmra.mxu0 %v4835_v37  ;;  %v1929_v20 = vadd.f32 %v1928_v4, %v1916_v10  ;;  %v3440_v24 = vor.u32 %v4181_v9, %v3437_v12  ;;  %v3760_v30 = vor.u32 %v4261_v17, %v3757_v14  ;;  %v4044_v4 = vld [vmem:[%s6288_s1 + $0x138] sm:$0xf0]  ;;  %v3363_v12 = vld [vmem:[%s6288_s1 + $0x4e8] sm:$0xf] }
  0xc4   :  { %2166 = vmatpush.bf16.msra.mxu0 %v3360_v25  ;;  %2135 = vmatmul.bf16.vlgmr.msrb.gmra.mxu1 %v4681_v19  ;;  %v3600_v25 = vor.u32 %v4221_v13, %v3597_v16  ;;  %v4124_v9 = vld [vmem:[%s6288_s1 + $0x3b8] sm:$0xf0]  ;;  %v2884_v17 = vor.u32 %v4044_v4, %v2883_v3  ;;  %v2803_v4 = vld [vmem:[%s6288_s1 + $0x88] sm:$0xf] }
  0xc5   :  { %2179 = vmatpush.bf16.msra.mxu1 %v3520_v26  ;;  %2148 = vmatmul.bf16.vlgmr.msrb.gmra.mxu2 %v4683_v21  ;;  %v4136_v26 = vld [vmem:[%s6288_s1 + $0x41c] sm:$0xf] }
  0xc6   :  { %2192 = vmatpush.bf16.msra.mxu2 %v3680_v27  ;;  %2161 = vmatmul.bf16.vlgmr.msrb.gmra.mxu3 %v4679_v18  ;;  %v3257_v27 = vld [vmem:[%s6288_s1 + $0x42c] sm:$0xf0]  ;;  %v4164_v13 = vld [vmem:[%s6288_s1 + $0x4f8] sm:$0xf0] }
  0xc7   :  { %2205 = vmatpush.bf16.msra.mxu3 %v3840_v31  ;;  %v3417_v31 = vld [vmem:[%s6288_s1 + $0x56c] sm:$0xf0]  ;;  %v3260_v38 = vor.u32 %v4136_v26, %v3257_v27  ;;  %v3364_v26 = vor.u32 %v4164_v13, %v3363_v12  ;;  %v4079_v27 = vld [vmem:[%s6288_s1 + $0x250] sm:$0xf0]  ;;  %v4104_v12 = vld [vmem:[%s6288_s1 + $0x318] sm:$0xf0] }
  0xc8   :  { %2167 = vmatpush.bf16.msra.mxu0 %v3340_v39  ;;  %v1941_v29 = vpop.f32.mrf.mxu2  ;;  %v1917_v39 = vpop.f32.mrf.mxu0  ;;  %v3283_v13 = vld [vmem:[%s6288_s1 + $0x448] sm:$0xf] }
  0xc9   :  { %2180 = vmatpush.bf16.msra.mxu1 %v3500_v42  ;;  %v5734_v34 = vadd.f32 %v1941_v29, %v1929_v20  ;;  %v1930_v42 = vpop.f32.mrf.mxu1  ;;  %v3204_v20 = vor.u32 %v4124_v9, %v3203_v8  ;;  %v4119_v29 = vld [vmem:[%s6288_s1 + $0x390] sm:$0xf0]  ;;  %v4034_v39 = vld [vmem:[%s6288_s1 + $0xe8] sm:$0xf0] }
  0xca   :  { %2193 = vmatpush.bf16.msra.mxu2 %v3660_v43  ;;  %v3420_v43 = vor.u32 %v4176_v28, %v3417_v31  ;;  %v3183_v28 = vld [vmem:[%s6288_s1 + $0x380] sm:$0xf]  ;;  %v4159_v31 = vld [vmem:[%s6288_s1 + $0x4d0] sm:$0xf0]  ;;  %v3003_v42 = vld [vmem:[%s6288_s1 + $0x218] sm:$0xf]  ;;  %v2844_v50 = vor.u32 %v4034_v39, %v2843_v33 }
  0xcb   :  { %2206 = vmatpush.bf16.msra.mxu3 %v3820_v48  ;;  %v3740_v48 = vor.u32 %v4256_v35, %v3737_v36  ;;  %v1954_v35 = vpop.f32.mrf.mxu3  ;;  %v3263_v33 = vld [vmem:[%s6288_s1 + $0x420] sm:$0xf] }
  0xcc   :  { %2168 = vmatpush.bf16.msra.mxu0 %v3320_v54  ;;  %v3240_v54 = vor.u32 %v4131_v45, %v3237_v46  ;;  %v4074_v45 = vld [vmem:[%s6288_s1 + $0x228] sm:$0xf0]  ;;  %v3163_v46 = vld [vmem:[%s6288_s1 + $0x358] sm:$0xf] }
  0xcd   :  { %2181 = vmatpush.bf16.msra.mxu1 %v3480_v55  ;;  %v4126_v55 = vld [vmem:[%s6288_s1 + $0x3cc] sm:$0xf]  ;;  %v3004_v51 = vor.u32 %v4074_v45, %v3003_v42  ;;  %v3164_v52 = vor.u32 %v4114_v47, %v3163_v46  ;;  %v2923_v46 = vld [vmem:[%s6288_s1 + $0x178] sm:$0xf] }
  0xce   :  { %2194 = vmatpush.bf16.msra.mxu2 %v3640_v56  ;;  %v3217_v56 = vld [vmem:[%s6288_s1 + $0x3dc] sm:$0xf0]  ;;  %v4014_v45 = vld [vmem:[%s6288_s1 + $0x48] sm:$0xf0] }
  0xcf   :  { %2207 = vmatpush.bf16.msra.mxu3 %v3800_v60  ;;  %v3377_v60 = vld [vmem:[%s6288_s1 + $0x51c] sm:$0xf0] }
  0xd0   :  { %2169 = vmatpush.bf16.msra.mxu0 %v3300_v2  ;;  %v1943_v62 = vpop.f32.mrf.mxu2  ;;  %v3697_v2 = vld [vmem:[%s6288_s1 + $0x79c] sm:$0xf0]  ;;  %v3380_v10 = vor.u32 %v4166_v59, %v3377_v60  ;;  %v3143_v59 = vld [vmem:[%s6288_s1 + $0x330] sm:$0xf]  ;;  %v4109_v60 = vld [vmem:[%s6288_s1 + $0x340] sm:$0xf0] }
  0xd1   :  { %2182 = vmatpush.bf16.msra.mxu1 %v3460_v5  ;;  %v3043_v5 = vld [vmem:[%s6288_s1 + $0x268] sm:$0xf]  ;;  %v3700_v16 = vor.u32 %v4246_v1, %v3697_v2  ;;  %v4149_v62 = vld [vmem:[%s6288_s1 + $0x480] sm:$0xf0]  ;;  %v3144_v3 = vor.u32 %v4109_v60, %v3143_v59  ;;  %v2903_v59 = vld [vmem:[%s6288_s1 + $0x150] sm:$0xf] }
  0xd2   :  { %2195 = vmatpush.bf16.msra.mxu2 %v3620_v6  ;;  %v3220_v6 = vor.u32 %v4126_v55, %v3217_v56  ;;  %v3044_v14 = vor.u32 %v4084_v7, %v3043_v5  ;;  %v2983_v55 = vld [vmem:[%s6288_s1 + $0x1f0] sm:$0xf]  ;;  %v4024_v5 = vld [vmem:[%s6288_s1 + $0x98] sm:$0xf0]  ;;  %v4049_v60 = vld [vmem:[%s6288_s1 + $0x160] sm:$0xf0] }
  0xd3   :  { %2208 = vmatpush.bf16.msra.mxu3 %v3780_v11  ;;  %v3540_v11 = vor.u32 %v4206_v61, %v3537_v0  ;;  %v3303_v61 = vld [vmem:[%s6288_s1 + $0x470] sm:$0xf]  ;;  %v1956_v8 = vpop.f32.mrf.mxu3 }
  0xd4   :  { %2170 = vmatpush.bf16.msra.mxu0 %v3280_v23  ;;  %v2863_v23 = vld [vmem:[%s6288_s1 + $0x100] sm:$0xf]  ;;  %v3304_v9 = vor.u32 %v4149_v62, %v3303_v61  ;;  %v3063_v61 = vld [vmem:[%s6288_s1 + $0x290] sm:$0xf]  ;;  %v3843_v8 = vld [vmem:[%s6288_s1 + $0x8a8] sm:$0xf] }
  0xd5   :  { %2183 = vmatpush.bf16.msra.mxu1 %v3440_v24  ;;  %v4039_v24 = vld [vmem:[%s6288_s1 + $0x110] sm:$0xf0] }
  0xd6   :  { %2196 = vmatpush.bf16.msra.mxu2 %v3600_v25  ;;  %v3023_v25 = vld [vmem:[%s6288_s1 + $0x240] sm:$0xf]  ;;  %v2864_v32 = vor.u32 %v4039_v24, %v2863_v23 }
  0xd7   :  { %2209 = vmatpush.bf16.msra.mxu3 %v3760_v30  ;;  %v3343_v30 = vld [vmem:[%s6288_s1 + $0x4c0] sm:$0xf]  ;;  %v3024_v36 = vor.u32 %v4079_v27, %v3023_v25  ;;  %v4019_v25 = vld [vmem:[%s6288_s1 + $0x70] sm:$0xf0] }
  0xd8   :  { %2171 = vmatpush.bf16.msra.mxu0 %v3260_v38  ;;  %v3184_v38 = vor.u32 %v4119_v29, %v3183_v28  ;;  %v2783_v24 = vld [vmem:[%s6288_s1 + $0x60] sm:$0xf]  ;;  %v4059_v29 = vld [vmem:[%s6288_s1 + $0x1b0] sm:$0xf0] }
  0xd9   :  { %2184 = vmatpush.bf16.msra.mxu1 %v3420_v43  ;;  %v364_v43 = vperm.slane %v5508_v15, 1 }
  0xda   :  { %2197 = vmatpush.bf16.msra.mxu2 %v3580_v44  ;;  %v3344_v44 = vor.u32 %v4159_v31, %v3343_v30  ;;  %v3103_v30 = vld [vmem:[%s6288_s1 + $0x2e0] sm:$0xf]  ;;  %v4099_v31 = vld [vmem:[%s6288_s1 + $0x2f0] sm:$0xf0] }
  0xdb   :  { %2210 = vmatpush.bf16.msra.mxu3 %v3740_v48  ;;  %v3323_v48 = vld [vmem:[%s6288_s1 + $0x498] sm:$0xf]  ;;  %v1955_v56 = vadd.f32 %v1954_v35, %v364_v43  ;;  %v4139_v35 = vld [vmem:[%s6288_s1 + $0x430] sm:$0xf0]  ;;  %v3104_v43 = vor.u32 %v4099_v31, %v3103_v30 }
  0xdc   :  { %2172 = vmatpush.bf16.msra.mxu0 %v3240_v54  ;;  %v4029_v54 = vld [vmem:[%s6288_s1 + $0xc0] sm:$0xf0]  ;;  %v4291_v30 = vld [vmem:[%s6290_s3 + $0x30] sm:$0xff] }
  0xdd   :  { %2185 = vmatpush.bf16.msra.mxu1 %v3400_v57  ;;  %v3324_v57 = vor.u32 %v4154_v49, %v3323_v48  ;;  %v3264_v48 = vor.u32 %v4139_v35, %v3263_v33  ;;  %v4054_v49 = vld [vmem:[%s6288_s1 + $0x188] sm:$0xf0]  ;;  %v3483_v35 = vld [vmem:[%s6288_s1 + $0x5d8] sm:$0xf] }
  0xde   :  { %2198 = vmatpush.bf16.msra.mxu2 %v3560_v58  ;;  %v4069_v58 = vld [vmem:[%s6288_s1 + $0x200] sm:$0xf0] }
  0xdf   :  { %2211 = vmatpush.bf16.msra.mxu3 %v3720_v63  ;;  %v2824_v63 = vor.u32 %v4029_v54, %v2823_v53  ;;  %v2984_v2 = vor.u32 %v4069_v58, %v2983_v55  ;;  %v4134_v53 = vld [vmem:[%s6288_s1 + $0x408] sm:$0xf0]  ;;  %v2743_v55 = vld [vmem:[%s6288_s1 + $0x10] sm:$0xf] }
  0xe0   :  { %2173 = vmatpush.bf16.msra.mxu0 %v3220_v6  ;;  %v1967_v0 = vpop.f32.mrf.mxu0  ;;  %v2963_v6 = vld [vmem:[%s6288_s1 + $0x1c8] sm:$0xf] }
  0xe1   :  { %2186 = vmatpush.bf16.msra.mxu1 %v3380_v10  ;;  %v1980_v1 = vpop.f32.mrf.mxu1  ;;  %v1968_v7 = vadd.f32 %v1967_v0, %v1955_v56  ;;  %v4064_v10 = vld [vmem:[%s6288_s1 + $0x1d8] sm:$0xf0]  ;;  %v4009_v56 = vld [vmem:[%s6288_s1 + $0x20] sm:$0xf0] }
  0xe2   :  { %2199 = vmatpush.bf16.msra.mxu2 %v3540_v11  ;;  %v3123_v11 = vld [vmem:[%s6288_s1 + $0x308] sm:$0xf]  ;;  %v4089_v0 = vld [vmem:[%s6288_s1 + $0x2a0] sm:$0xf0] }
  0xe3   :  { %2212 = vmatpush.bf16.msra.mxu3 %v3700_v16  ;;  %2174 = vmatmul.bf16.vlgmr.msra.gmra.mxu0 %v4685_v22  ;;  %v4144_v16 = vld [vmem:[%s6288_s1 + $0x458] sm:$0xf0]  ;;  %v3124_v23 = vor.u32 %v4104_v12, %v3123_v11  ;;  %v3064_v11 = vor.u32 %v4089_v0, %v3063_v61  ;;  %v3763_v61 = vld [vmem:[%s6288_s1 + $0x808] sm:$0xf] }
  0xe4   :  { %2218 = vmatpush.bf16.msrb.mxu0 %v2884_v17  ;;  %2187 = vmatmul.bf16.vlgmr.msra.gmra.mxu1 %v4843_v40  ;;  %v1981_v17 = vadd.f32 %v1980_v1, %v1968_v7  ;;  %v3284_v28 = vor.u32 %v4144_v16, %v3283_v13  ;;  %v3223_v1 = vld [vmem:[%s6288_s1 + $0x3d0] sm:$0xf]  ;;  %v4244_v7 = vld [vmem:[%s6288_s1 + $0x778] sm:$0xf0] }
  0xe5   :  { %2231 = vmatpush.bf16.msrb.mxu1 %v3044_v14  ;;  %2200 = vmatmul.bf16.vlgmr.msra.gmra.mxu2 %v4845_v41  ;;  %v2804_v14 = vor.u32 %v4024_v5, %v2803_v4  ;;  %v4204_v4 = vld [vmem:[%s6288_s1 + $0x638] sm:$0xf0]  ;;  %v3683_v5 = vld [vmem:[%s6288_s1 + $0x768] sm:$0xf] }
  0xe6   :  { %2244 = vmatpush.bf16.msrb.mxu2 %v3204_v20  ;;  %2213 = vmatmul.bf16.vlgmr.msra.gmra.mxu3 %v4835_v37  ;;  %v2964_v20 = vor.u32 %v4064_v10, %v2963_v6  ;;  %v2744_v6 = vor.u32 %v4009_v56, %v2743_v55  ;;  %v2904_v10 = vor.u32 %v4049_v60, %v2903_v59  ;;  %v3603_v59 = vld [vmem:[%s6288_s1 + $0x6c8] sm:$0xf]  ;;  %v4224_v60 = vld [vmem:[%s6288_s1 + $0x6d8] sm:$0xf0] }
  0xe7   :  { %2257 = vmatpush.bf16.msrb.mxu3 %v3364_v26  ;;  %v2943_v26 = vld [vmem:[%s6288_s1 + $0x1a0] sm:$0xf]  ;;  %v4288_v0 = vld [vmem:[%s6290_s3 + $0x18] sm:$0xff] }
  0xe8   :  { %2219 = vmatpush.bf16.msrb.mxu0 %v2864_v32  ;;  %v1993_v27 = vpop.f32.mrf.mxu2  ;;  %v2944_v42 = vor.u32 %v4059_v29, %v2943_v26  ;;  %v4239_v26 = vld [vmem:[%s6288_s1 + $0x750] sm:$0xf0] }
  0xe9   :  { %2232 = vmatpush.bf16.msrb.mxu1 %v3024_v36  ;;  %v5933_v32 = vadd.f32 %v1993_v27, %v1981_v17  ;;  %v2784_v36 = vor.u32 %v4019_v25, %v2783_v24  ;;  %v1982_v39 = vpop.f32.mrf.mxu1  ;;  %v5950_v47 = vpop.f32.mrf.mxu3  ;;  %v4292_v17 = vld [vmem:[%s6290_s3 + $0x38] sm:$0xff]  ;;  %v4199_v24 = vld [vmem:[%s6288_s1 + $0x610] sm:$0xf0]  ;;  %v3663_v25 = vld [vmem:[%s6288_s1 + $0x740] sm:$0xf] }
  0xea   :  { %2245 = vmatpush.bf16.msrb.mxu2 %v3184_v38  ;;  %v1969_v38 = vpop.f32.mrf.mxu0  ;;  %v3823_v27 = vld [vmem:[%s6288_s1 + $0x880] sm:$0xf]  ;;  %v3664_v31 = vor.u32 %v4239_v26, %v3663_v25  ;;  %v4234_v39 = vld [vmem:[%s6288_s1 + $0x728] sm:$0xf0]  ;;  %v3723_v26 = vld [vmem:[%s6288_s1 + $0x7b8] sm:$0xf] }
  0xeb   :  { %2258 = vmatpush.bf16.msrb.mxu3 %v3344_v44  ;;  %v2763_v44 = vld [vmem:[%s6288_s1 + $0x38] sm:$0xf]  ;;  %v4214_v25 = vld [vmem:[%s6288_s1 + $0x688] sm:$0xf0] }
  0xec   :  { %2220 = vmatpush.bf16.msrb.mxu0 %v2844_v50  ;;  %v3083_v50 = vld [vmem:[%s6288_s1 + $0x2b8] sm:$0xf]  ;;  %v2764_v54 = vor.u32 %v4014_v45, %v2763_v44 }
  0xed   :  { %2233 = vmatpush.bf16.msrb.mxu1 %v3004_v51  ;;  %v4094_v51 = vld [vmem:[%s6288_s1 + $0x2c8] sm:$0xf0]  ;;  %v3643_v38 = vld [vmem:[%s6288_s1 + $0x718] sm:$0xf] }
  0xee   :  { %2246 = vmatpush.bf16.msrb.mxu2 %v3164_v52  ;;  %v3243_v52 = vld [vmem:[%s6288_s1 + $0x3f8] sm:$0xf]  ;;  %v3084_v58 = vor.u32 %v4094_v51, %v3083_v50  ;;  %v3644_v45 = vor.u32 %v4234_v39, %v3643_v38  ;;  %v4269_v50 = vld [vmem:[%s6288_s1 + $0x840] sm:$0xf0]  ;;  %v3703_v39 = vld [vmem:[%s6288_s1 + $0x790] sm:$0xf] }
  0xef   :  { %2259 = vmatpush.bf16.msrb.mxu3 %v3324_v57  ;;  %v2924_v57 = vor.u32 %v4054_v49, %v2923_v46  ;;  %v3783_v49 = vld [vmem:[%s6288_s1 + $0x830] sm:$0xf]  ;;  %v4209_v38 = vld [vmem:[%s6288_s1 + $0x660] sm:$0xf0] }
  0xf0   :  { %2221 = vmatpush.bf16.msrb.mxu0 %v2824_v63  ;;  %v1995_v62 = vpop.f32.mrf.mxu2  ;;  %v3244_v63 = vor.u32 %v4134_v53, %v3243_v52  ;;  %v4289_v53 = vld [vmem:[%s6290_s3 + $0x20] sm:$0xff]  ;;  %v3784_v56 = vor.u32 %v4269_v50, %v3783_v49  ;;  %v4299_v49 = vld [vmem:[%s6290_s3 + $0x70] sm:$0xff] }
  0xf1   :  { %2234 = vmatpush.bf16.msrb.mxu1 %v2984_v2  ;;  %v4129_v2 = vld [vmem:[%s6288_s1 + $0x3e0] sm:$0xf0]  ;;  %v2008_v12 = vpop.f32.mrf.mxu3  ;;  %v4264_v62 = vld [vmem:[%s6288_s1 + $0x818] sm:$0xf0] }
  0xf2   :  { %2247 = vmatpush.bf16.msrb.mxu2 %v3144_v3  ;;  %v3523_v3 = vld [vmem:[%s6288_s1 + $0x628] sm:$0xf]  ;;  %v3224_v13 = vor.u32 %v4129_v2, %v3223_v1  ;;  %v3604_v1 = vor.u32 %v4224_v60, %v3603_v59  ;;  %v3764_v2 = vor.u32 %v4264_v62, %v3763_v61  ;;  %v2007_v59 = vadd.f32 %v5950_v47, %v5933_v32  ;;  %v4304_v61 = vld [vmem:[%s6290_s3 + $0x98] sm:$0xff] }
  0xf3   :  { %2260 = vmatpush.bf16.msrb.mxu3 %v3304_v9  ;;  %v4284_v9 = vld [vmem:[%s6288_s1 + $0x8b8] sm:$0xf0]  ;;  %v3524_v16 = vor.u32 %v4204_v4, %v3523_v3  ;;  %v3423_v3 = vld [vmem:[%s6288_s1 + $0x560] sm:$0xf]  ;;  %v4179_v4 = vld [vmem:[%s6288_s1 + $0x570] sm:$0xf0] }
  0xf4   :  { %2222 = vmatpush.bf16.msrb.mxu0 %v2804_v14  ;;  %v3684_v14 = vor.u32 %v4244_v7, %v3683_v5  ;;  %v3583_v5 = vld [vmem:[%s6288_s1 + $0x6a0] sm:$0xf]  ;;  %v3424_v12 = vor.u32 %v4179_v4, %v3423_v3  ;;  %v4314_v3 = vld [vmem:[%s6290_s3 + $0xe8] sm:$0xff] }
  0xf5   :  { %2235 = vmatpush.bf16.msrb.mxu1 %v2964_v20  ;;  %v3844_v20 = vor.u32 %v4284_v9, %v3843_v8  ;;  %v3743_v7 = vld [vmem:[%s6288_s1 + $0x7e0] sm:$0xf]  ;;  %v4259_v8 = vld [vmem:[%s6288_s1 + $0x7f0] sm:$0xf0] }
  0xf6   :  { %2248 = vmatpush.bf16.msrb.mxu2 %v3124_v23  ;;  %v3503_v23 = vld [vmem:[%s6288_s1 + $0x600] sm:$0xf] }
  0xf7   :  { %2261 = vmatpush.bf16.msrb.mxu3 %v3284_v28  ;;  %v4279_v28 = vld [vmem:[%s6288_s1 + $0x890] sm:$0xf0]  ;;  %v3504_v29 = vor.u32 %v4199_v24, %v3503_v23  ;;  %v4174_v23 = vld [vmem:[%s6288_s1 + $0x548] sm:$0xf0]  ;;  %v3563_v24 = vld [vmem:[%s6288_s1 + $0x678] sm:$0xf] }
  0xf8   :  { %2223 = vmatpush.bf16.msrb.mxu0 %v2784_v36  ;;  %v3824_v33 = vor.u32 %v4279_v28, %v3823_v27  ;;  %v4194_v36 = vld [vmem:[%s6288_s1 + $0x5e8] sm:$0xf0] }
  0xf9   :  { %2236 = vmatpush.bf16.msrb.mxu1 %v2944_v42  ;;  %v3803_v42 = vld [vmem:[%s6288_s1 + $0x858] sm:$0xf]  ;;  %v3484_v44 = vor.u32 %v4194_v36, %v3483_v35  ;;  %v4254_v27 = vld [vmem:[%s6288_s1 + $0x7c8] sm:$0xf0]  ;;  %v4169_v35 = vld [vmem:[%s6288_s1 + $0x520] sm:$0xf0] }
  0xfa   :  { %2249 = vmatpush.bf16.msrb.mxu2 %v3104_v43  ;;  %v4274_v43 = vld [vmem:[%s6288_s1 + $0x868] sm:$0xf0]  ;;  %v3543_v36 = vld [vmem:[%s6288_s1 + $0x650] sm:$0xf] }
  0xfb   :  { %2262 = vmatpush.bf16.msrb.mxu3 %v3264_v48  ;;  %v3804_v46 = vor.u32 %v4274_v43, %v3803_v42  ;;  %v3463_v48 = vld [vmem:[%s6288_s1 + $0x5b0] sm:$0xf]  ;;  %v4249_v42 = vld [vmem:[%s6288_s1 + $0x7a0] sm:$0xf0] }
  0xfc   :  { %2224 = vmatpush.bf16.msrb.mxu0 %v2764_v54 }
  0xfd   :  { %2237 = vmatpush.bf16.msrb.mxu1 %v2924_v57  ;;  %v3443_v57 = vld [vmem:[%s6288_s1 + $0x588] sm:$0xf] }
  0xfe   :  { %2250 = vmatpush.bf16.msrb.mxu2 %v3084_v58  ;;  %v4184_v58 = vld [vmem:[%s6288_s1 + $0x598] sm:$0xf0] }
  0xff   :  { %2263 = vmatpush.bf16.msrb.mxu3 %v3244_v63  ;;  %v3444_v63 = vor.u32 %v4184_v58, %v3443_v57  ;;  %v4296_v57 = vld [vmem:[%s6290_s3 + $0x58] sm:$0xff] }
 0x100   :  { %2225 = vmatpush.bf16.msrb.mxu0 %v2744_v6  ;;  %v6076_v51 = vpop.f32.mrf.mxu0  ;;  %v4219_v6 = vld [vmem:[%s6288_s1 + $0x6b0] sm:$0xf0]  ;;  %v4316_v58 = vld [vmem:[%s6290_s3 + $0xf8] sm:$0xff] }
 0x101   :  { %2238 = vmatpush.bf16.msrb.mxu1 %v2904_v10  ;;  %v6081_v54 = vpop.f32.mrf.mxu1  ;;  %v2020_v47 = vadd.f32 %v6076_v51, %v2007_v59  ;;  %v4321_v59 = vld [vmem:[%s6290_s3 + $0x120] sm:$0xff] }
 0x102   :  { %2251 = vmatpush.bf16.msrb.mxu2 %v3064_v11 }
 0x103   :  { %2264 = vmatpush.bf16.msrb.mxu3 %v3224_v13  ;;  %2226 = vmatmul.bf16.vlgmr.msrb.gmra.mxu0 %v4681_v19  ;;  %v4189_v19 = vld [vmem:[%s6288_s1 + $0x5c0] sm:$0xf0]  ;;  %v4287_v13 = vld [vmem:[%s6290_s3 + $0x10] sm:$0xff]  ;;  %v2033_v51 = vadd.f32 %v6081_v54, %v2020_v47 }
 0x104   :  { %2270 = vmatpush.bf16.msra.mxu0 %v3524_v16  ;;  %2239 = vmatmul.bf16.vlgmr.msrb.gmra.mxu1 %v4683_v21  ;;  %v3623_v21 = vld [vmem:[%s6288_s1 + $0x6f0] sm:$0xf]  ;;  %v3464_v52 = vor.u32 %v4189_v19, %v3463_v48  ;;  %v4285_v48 = vld [vmem:[%s6290_s3] sm:$0xff]  ;;  %v4300_v19 = vld [vmem:[%s6290_s3 + $0x78] sm:$0xff] }
 0x105   :  { %2283 = vmatpush.bf16.msra.mxu1 %v3684_v14  ;;  %2252 = vmatmul.bf16.vlgmr.msrb.gmra.mxu2 %v4679_v18  ;;  %v4290_v18 = vld [vmem:[%s6290_s3 + $0x28] sm:$0xff]  ;;  %v3744_v14 = vor.u32 %v4259_v8, %v3743_v7  ;;  %v4301_v54 = vld [vmem:[%s6290_s3 + $0x80] sm:$0xff] }
 0x106   :  { %2296 = vmatpush.bf16.msra.mxu2 %v3844_v20  ;;  %2265 = vmatmul.bf16.vlgmr.msrb.gmra.mxu3 %v4685_v22  ;;  %v4229_v22 = vld [vmem:[%s6288_s1 + $0x700] sm:$0xf0]  ;;  %v3403_v20 = vld [vmem:[%s6288_s1 + $0x538] sm:$0xf] }
 0x107   :  { %2643 = vmatpush.bf16.msra.mxu3 %v4292_v17  ;;  %v3624_v55 = vor.u32 %v4229_v22, %v3623_v21  ;;  %v3584_v17 = vor.u32 %v4219_v6, %v3583_v5  ;;  %v3404_v28 = vor.u32 %v4174_v23, %v3403_v20  ;;  %v2309_v21 = vmax.f32 %v5734_v34, 0.0  ;;  %v4308_v22 = vld [vmem:[%s6290_s3 + $0xb8] sm:$0xff]  ;;  %v4307_v34 = vld [vmem:[%s6290_s3 + $0xb0] sm:$0xff]  ;;  %v4294_v5 = vld [vmem:[%s6290_s3 + $0x48] sm:$0xff] }
 0x108   :  { %2271 = vmatpush.bf16.msra.mxu0 %v3504_v29  ;;  %v6122_v9 = vpop.f32.mrf.mxu2  ;;  %v2021_v11 = vpop.f32.mrf.mxu0  ;;  %v4286_v29 = vld [vmem:[%s6290_s3 + $0x8] sm:$0xff] }
 0x109   :  { %2284 = vmatpush.bf16.msra.mxu1 %v3664_v31  ;;  %v6124_v10 = vpop.f32.mrf.mxu3  ;;  %v2034_v16 = vpop.f32.mrf.mxu1  ;;  %v3724_v31 = vor.u32 %v4254_v27, %v3723_v26  ;;  %v2314_v50 = vpack.c.bf16 %v2309_v21, %v2309_v21  ;;  %v4302_v6 = vld [vmem:[%s6290_s3 + $0x88] sm:$0xff]  ;;  %v4293_v11 = vld [vmem:[%s6290_s3 + $0x40] sm:$0xff]  ;;  %v4311_v26 = vld [vmem:[%s6290_s3 + $0xd0] sm:$0xff] }
 0x10a   :  { %2297 = vmatpush.bf16.msra.mxu2 %v3824_v33  ;;  %v3383_v33 = vld [vmem:[%s6288_s1 + $0x510] sm:$0xf] }
 0x10b   :  { %2644 = vmatpush.bf16.msra.mxu3 %v4291_v30  ;;  %v3564_v30 = vor.u32 %v4214_v25, %v3563_v24 }
 0x10c   :  { %2272 = vmatpush.bf16.msra.mxu0 %v3484_v44 }
 0x10d   :  { %2285 = vmatpush.bf16.msra.mxu1 %v3644_v45  ;;  %v3544_v45 = vor.u32 %v4209_v38, %v3543_v36  ;;  %v4309_v36 = vld [vmem:[%s6290_s3 + $0xc0] sm:$0xff] }
 0x10e   :  { %2298 = vmatpush.bf16.msra.mxu2 %v3804_v46  ;;  %v3704_v46 = vor.u32 %v4249_v42, %v3703_v39  ;;  %v4327_v42 = vld [vmem:[%s6289_s2] sm:$0x1f] }
 0x10f   :  { %2645 = vmatpush.bf16.msra.mxu3 %v4290_v18  ;;  %v3384_v18 = vor.u32 %v4169_v35, %v3383_v33 }
 0x110   :  { %2273 = vmatpush.bf16.msra.mxu0 %v3464_v52  ;;  %v2047_v43 = vpop.f32.mrf.mxu2  ;;  %v4298_v52 = vld [vmem:[%s6290_s3 + $0x68] sm:$0xff] }
 0x111   :  { %2286 = vmatpush.bf16.msra.mxu1 %v3624_v55  ;;  %v2060_v44 = vpop.f32.mrf.mxu3  ;;  %v366_v43 = vperm.slane %v4327_v42, 3 }
 0x112   :  { %2299 = vmatpush.bf16.msra.mxu2 %v3784_v56  ;;  %v365_v56 = vperm.slane %v5508_v15, 2  ;;  %v4315_v15 = vld [vmem:[%s6290_s3 + $0xf0] sm:$0xff] }
 0x113   :  { %2646 = vmatpush.bf16.msra.mxu3 %v4289_v53  ;;  %v4297_v53 = vld [vmem:[%s6290_s3 + $0x60] sm:$0xff] }
 0x114   :  { %2274 = vmatpush.bf16.msra.mxu0 %v3444_v63  ;;  %v2046_v63 = vadd.f32 %v6122_v9, %v365_v56  ;;  %v4313_v9 = vld [vmem:[%s6290_s3 + $0xe0] sm:$0xff] }
 0x115   :  { %2287 = vmatpush.bf16.msra.mxu1 %v3604_v1  ;;  %v4303_v1 = vld [vmem:[%s6290_s3 + $0x90] sm:$0xff] }
 0x116   :  { %2300 = vmatpush.bf16.msra.mxu2 %v3764_v2  ;;  %v2059_v4 = vadd.f32 %v6124_v10, %v2046_v63  ;;  %v4318_v63 = vld [vmem:[%s6290_s3 + $0x108] sm:$0xff] }
 0x117   :  { %2647 = vmatpush.bf16.msra.mxu3 %v4288_v0  ;;  %v4295_v0 = vld [vmem:[%s6290_s3 + $0x50] sm:$0xff] }
 0x118   :  { %2275 = vmatpush.bf16.msra.mxu0 %v3424_v12  ;;  %v2310_v12 = vmax.f32 %v2033_v51, 0.0 }
 0x119   :  { %2288 = vmatpush.bf16.msra.mxu1 %v3584_v17 }
 0x11a   :  { %2301 = vmatpush.bf16.msra.mxu2 %v3744_v14  ;;  %v2315_v17 = vpack.c.bf16 %v2310_v12, %v2310_v12 }
 0x11b   :  { %2648 = vmatpush.bf16.msra.mxu3 %v4287_v13  ;;  %v4312_v13 = vld [vmem:[%s6290_s3 + $0xd8] sm:$0xff] }
 0x11c   :  { %2276 = vmatpush.bf16.msra.mxu0 %v3404_v28 }
 0x11d   :  { %2289 = vmatpush.bf16.msra.mxu1 %v3564_v30 }
 0x11e   :  { %2302 = vmatpush.bf16.msra.mxu2 %v3724_v31  ;;  %v4310_v31 = vld [vmem:[%s6290_s3 + $0xc8] sm:$0xff] }
 0x11f   :  { %2649 = vmatpush.bf16.msra.mxu3 %v4286_v29 }
 0x120   :  { %2277 = vmatpush.bf16.msra.mxu0 %v3384_v18  ;;  %v2071_v55 = vpop.f32.mrf.mxu0 }
 0x121   :  { %2290 = vmatpush.bf16.msra.mxu1 %v3544_v45  ;;  %v2072_v10 = vadd.f32 %v2071_v55, %v2059_v4 }
 0x122   :  { %2303 = vmatpush.bf16.msra.mxu2 %v3704_v46 }
 0x123   :  { %2650 = vmatpush.bf16.msra.mxu3 %v4285_v48  ;;  %2278 = vmatmul.bf16.vlgmr.msra.gmra.mxu0 %v4843_v40  ;;  %v4306_v40 = vld [vmem:[%s6290_s3 + $0xa8] sm:$0xff] }
 0x124   :  { %2656 = vmatpush.bf16.msrb.mxu0 %v4300_v19  ;;  %2291 = vmatmul.bf16.vlgmr.msra.gmra.mxu1 %v4845_v41  ;;  %v2084_v41 = vpop.f32.mrf.mxu1 }
 0x125   :  { %2669 = vmatpush.bf16.msrb.mxu1 %v4308_v22  ;;  %2304 = vmatmul.bf16.vlgmr.msra.gmra.mxu2 %v4835_v37  ;;  %v4305_v37 = vld [vmem:[%s6290_s3 + $0xa0] sm:$0xff]  ;;  %v2085_v16 = vadd.f32 %v2084_v41, %v2072_v10  ;;  %v4324_v22 = vld [vmem:[%s6290_s3 + $0x138] sm:$0xff] }
 0x126   :  { %2651 = vmatmul.bf16.vlgmr.msra.gmra.mxu3 %v2314_v50  ;;  %2682 = vmatpush.bf16.msrb.mxu2 %v4316_v58 }
 0x127   :  { %2695 = vmatpush.bf16.msrb.mxu3 %v4324_v22 }
 0x128   :  { %2657 = vmatpush.bf16.msrb.mxu0 %v4299_v49  ;;  %v2097_v60 = vpop.f32.mrf.mxu2  ;;  %v2073_v32 = vpop.f32.mrf.mxu0 }
 0x129   :  { %2670 = vmatpush.bf16.msrb.mxu1 %v4307_v34  ;;  %v2110_v62 = vpop.f32.mrf.mxu3  ;;  %v2098_v14 = vadd.f32 %v2097_v60, %v2085_v16  ;;  %v4320_v60 = vld [vmem:[%s6290_s3 + $0x118] sm:$0xff]  ;;  %v4317_v32 = vld [vmem:[%s6290_s3 + $0x100] sm:$0xff] }
 0x12a   :  { %2683 = vmatpush.bf16.msrb.mxu2 %v4315_v15 }
 0x12b   :  { %v2111_v20 = vadd.f32 %v2110_v62, %v2098_v14 }
 0x12c   :  { %2658 = vmatpush.bf16.msrb.mxu0 %v4298_v52  ;;  %v2086_v2 = vpop.f32.mrf.mxu1  ;;  %v4323_v52 = vld [vmem:[%s6290_s3 + $0x130] sm:$0xff] }
 0x12d   :  { %2671 = vmatpush.bf16.msrb.mxu1 %v4306_v40  ;;  %2696 = vmatpush.bf16.msrb.mxu3 %v4323_v52 }
 0x12e   :  { %2684 = vmatpush.bf16.msrb.mxu2 %v4314_v3  ;;  %v367_v3 = vperm.slane %v4327_v42, 4 }
 0x130   :  { %2659 = vmatpush.bf16.msrb.mxu0 %v4297_v53  ;;  %v2099_v7 = vpop.f32.mrf.mxu2 }
 0x131   :  { %2672 = vmatpush.bf16.msrb.mxu1 %v4305_v37  ;;  %v2112_v8 = vpop.f32.mrf.mxu3  ;;  %v4322_v37 = vld [vmem:[%s6290_s3 + $0x128] sm:$0xff] }
 0x132   :  { %2685 = vmatpush.bf16.msrb.mxu2 %v4313_v9  ;;  %2697 = vmatpush.bf16.msrb.mxu3 %v4322_v37 }
 0x134   :  { %2660 = vmatpush.bf16.msrb.mxu0 %v4296_v57 }
 0x135   :  { %2673 = vmatpush.bf16.msrb.mxu1 %v4304_v61  ;;  %v4319_v61 = vld [vmem:[%s6290_s3 + $0x110] sm:$0xff] }
 0x136   :  { %2686 = vmatpush.bf16.msrb.mxu2 %v4312_v13  ;;  %2698 = vmatpush.bf16.msrb.mxu3 %v4321_v59 }
 0x138   :  { %2661 = vmatpush.bf16.msrb.mxu0 %v4295_v0 }
 0x139   :  { %2674 = vmatpush.bf16.msrb.mxu1 %v4303_v1 }
 0x13a   :  { %2687 = vmatpush.bf16.msrb.mxu2 %v4311_v26  ;;  %2699 = vmatpush.bf16.msrb.mxu3 %v4320_v60  ;;  %v4326_v26 = vld [vmem:[%s6291_s4] ss:$0 sm:$0xff] }
 0x13c   :  { %2662 = vmatpush.bf16.msrb.mxu0 %v4294_v5 }
 0x13d   :  { %2675 = vmatpush.bf16.msrb.mxu1 %v4302_v6 }
 0x13e   :  { %2688 = vmatpush.bf16.msrb.mxu2 %v4310_v31  ;;  %2700 = vmatpush.bf16.msrb.mxu3 %v4319_v61 }
 0x140   :  { %2663 = vmatpush.bf16.msrb.mxu0 %v4293_v11  ;;  %v2123_v23 = vpop.f32.mrf.mxu0 }
 0x141   :  { %2676 = vmatpush.bf16.msrb.mxu1 %v4301_v54  ;;  %v2124_v24 = vadd.f32 %v2123_v23, %v2111_v20  ;;  %v2136_v25 = vpop.f32.mrf.mxu1 }
 0x142   :  { %2689 = vmatpush.bf16.msrb.mxu2 %v4309_v36  ;;  %v2137_v44 = vadd.f32 %v2136_v25, %v366_v43  ;;  %2701 = vmatpush.bf16.msrb.mxu3 %v4318_v63 }
 0x143   :  { %2664 = vmatmul.bf16.vlgmr.msrb.gmra.mxu0 %v2315_v17  ;;  %v2311_v27 = vmax.f32 %v2124_v24, 0.0 }
 0x145   :  { %v2316_v28 = vpack.c.bf16 %v2311_v27, %v2311_v27 }
 0x146   :  { %2702 = vmatpush.bf16.msrb.mxu3 %v4317_v32 }
 0x147   :  { %2677 = vmatmul.bf16.vlgmr.msrb.gmra.mxu1 %v2316_v28 }
 0x148   :  { %v2149_v29 = vpop.f32.mrf.mxu2  ;;  %v2125_v33 = vpop.f32.mrf.mxu0 }
 0x149   :  { %v2162_v30 = vpop.f32.mrf.mxu3  ;;  %v2138_v35 = vpop.f32.mrf.mxu1  ;;  %v2150_v18 = vadd.f32 %v2149_v29, %v2137_v44 }
 0x14b   :  { %v2163_v45 = vadd.f32 %v2162_v30, %v2150_v18 }
 0x150   :  { %v2151_v38 = vpop.f32.mrf.mxu2 }
 0x151   :  { %v2164_v39 = vpop.f32.mrf.mxu3 }
 0x160   :  { %v2175_v46 = vpop.f32.mrf.mxu0 }
 0x161   :  { %v2176_v48 = vadd.f32 %v2175_v46, %v2163_v45  ;;  %v2188_v19 = vpop.f32.mrf.mxu1 }
 0x163   :  { %v2189_v21 = vadd.f32 %v2188_v19, %v2176_v48 }
 0x168   :  { %v2201_v49 = vpop.f32.mrf.mxu2  ;;  %v2177_v53 = vpop.f32.mrf.mxu0 }
 0x169   :  { %v2202_v50 = vadd.f32 %v2201_v49, %v2189_v21  ;;  %v2214_v34 = vpop.f32.mrf.mxu3  ;;  %v2190_v55 = vpop.f32.mrf.mxu1 }
 0x16b   :  { %v2215_v40 = vadd.f32 %v2214_v34, %v2202_v50 }
 0x16d   :  { %v2312_v41 = vmax.f32 %v2215_v40, 0.0 }
 0x16f   :  { %v2317_v56 = vpack.c.bf16 %v2312_v41, %v2312_v41 }
 0x170   :  { %v2203_v57 = vpop.f32.mrf.mxu2 }
 0x171   :  { %2690 = vmatmul.bf16.vlgmr.msrb.gmra.mxu2 %v2317_v56  ;;  %v2216_v58 = vpop.f32.mrf.mxu3 }
 0x180   :  { %v2227_v62 = vpop.f32.mrf.mxu0 }
 0x181   :  { %v2240_v15 = vpop.f32.mrf.mxu1  ;;  %v2228_v51 = vadd.f32 %v2227_v62, %v367_v3 }
 0x183   :  { %v2241_v6 = vadd.f32 %v2240_v15, %v2228_v51 }
 0x188   :  { %v2253_v0 = vpop.f32.mrf.mxu2  ;;  %v2229_v1 = vpop.f32.mrf.mxu0 }
 0x189   :  { %v2266_v47 = vpop.f32.mrf.mxu3  ;;  %v2242_v2 = vpop.f32.mrf.mxu1  ;;  %v2254_v7 = vadd.f32 %v2253_v0, %v2241_v6 }
 0x18b   :  { %v2267_v8 = vadd.f32 %v2266_v47, %v2254_v7 }
 0x190   :  { %v2255_v4 = vpop.f32.mrf.mxu2 }
 0x191   :  { %v2268_v5 = vpop.f32.mrf.mxu3 }
 0x1a0   :  { %v2279_v9 = vpop.f32.mrf.mxu0 }
 0x1a1   :  { %v2292_v10 = vpop.f32.mrf.mxu1  ;;  %v2280_v11 = vadd.f32 %v2279_v9, %v2267_v8 }
 0x1a3   :  { %v2293_v12 = vadd.f32 %v2292_v10, %v2280_v11 }
 0x1a8   :  { %v2305_v54 = vpop.f32.mrf.mxu2  ;;  %v2281_v17 = vpop.f32.mrf.mxu0 }
 0x1a9   :  { %v2306_v13 = vadd.f32 %v2305_v54, %v2293_v12  ;;  %v2652_v16 = vpop.f32.mrf.mxu3  ;;  %v2294_v14 = vpop.f32.mrf.mxu1 }
 0x1aa   :  { %v2653_v27 = vadd.f32 %v4326_v26, %v2652_v16 }
 0x1ab   :  { %v2313_v20 = vmax.f32 %v2306_v13, 0.0 }
 0x1ad   :  { %v2318_v23 = vpack.c.bf16 %v2313_v20, %v2313_v20 }
 0x1af   :  { %2703 = vmatmul.bf16.vlgmr.msrb.gmra.mxu3 %v2318_v23 }
 0x1b0   :  { %v2307_v24 = vpop.f32.mrf.mxu2 }
 0x1b1   :  { %v2654_v25 = vpop.f32.mrf.mxu3 }
 0x1c0   :  { %v2665_v28 = vpop.f32.mrf.mxu0 }
 0x1c1   :  { %v2666_v29 = vadd.f32 %v2665_v28, %v2653_v27 }
 0x1c4   :  { %v2678_v31 = vpop.f32.mrf.mxu1 }
 0x1c5   :  { %v2679_v33 = vadd.f32 %v2678_v31, %v2666_v29 }
 0x1c8   :  { %v2667_v30 = vpop.f32.mrf.mxu0 }
 0x1cc   :  { %v2680_v35 = vpop.f32.mrf.mxu1 }
 0x1f4   :  { %v2691_v36 = vpop.f32.mrf.mxu2 }
 0x1f5   :  { %v2692_v39 = vadd.f32 %v2691_v36, %v2679_v33 }
 0x1fc   :  { %v2693_v38 = vpop.f32.mrf.mxu2 }
 0x232   :  { %v2704_v42 = vpop.f32.mrf.mxu3 }
 0x233   :  { %v2705_v43 = vadd.f32 %v2704_v42, %v2692_v39 }
 0x235   :  { %2708 = vst [vmem:[#allocation2] sm:$0xff] %v2705_v43 }
 0x236   :  { %2719 = dma.vmem_to_hbm [thread:$0]  %s2715_s16, 128, %s2717_s19, [#allocation3]  }
 0x23a   :  { %v2706_v44 = vpop.f32.mrf.mxu3 }
 0x23b   :  { %4352 = dma.done.wait [#allocation3], 128  }
 0x23c   :  { %4353 = vsyncadd [#allocation3], 4294967168 }
 0x23d   :  { %2724 = vsyncpa [#allocation3], 1 }

</bundles_post_ra>
